<compile_context>
chip_gen: v6e
topology: v6e:2x2x1
jax: 0.10.0
libtpu: 0.0.40
codegen_flags: <defaults>
</compile_context>

<pallas_src>
import functools

import jax
import jax.numpy as jnp
from jax import lax
from jax.experimental import pallas as pl
from jax.experimental.pallas import tpu as pltpu

_VMEM_LIMIT = 48 * 1024 * 1024  # scoped-VMEM budget; leaves headroom on v7x (64 MiB)


# ----------------------------------------------------------------------------
# helpers
# ----------------------------------------------------------------------------
def _round_up(x, m):
    return (x + m - 1) // m * m


def _pick_tile(m, pref=256):
    """Largest row tile (multiple of 8, <= pref) dividing m; fallback = full."""
    if m <= pref:
        return m
    for t in (pref, 128, 64, 32, 16, 8):
        if m % t == 0:
            return t
    return m


def _layernorm_f32(x, g, b, eps):
    xf = x.astype(jnp.float32)
    mu = jnp.mean(xf, axis=-1, keepdims=True)
    var = jnp.mean(jnp.square(xf - mu), axis=-1, keepdims=True)
    return (xf - mu) * lax.rsqrt(var + eps) * g + b


# ----------------------------------------------------------------------------
# Kernel 1: plain tiled linear (patch embedding), row-padded to the tile size
# ----------------------------------------------------------------------------
def _linear_kernel(x_ref, w_ref, b_ref, o_ref):
    acc = jnp.dot(x_ref[...], w_ref[...], preferred_element_type=jnp.float32)
    o_ref[...] = (acc + b_ref[...]).astype(o_ref.dtype)


def pallas_linear(x, w, b):
    m, k = x.shape
    n = w.shape[1]
    # Pad M up to the tile so the grid never degrades to tiny tiles
    # (B*196 at real scale has no nice divisors -> would fall back to tm=8).
    tm = 256 if m >= 256 else _round_up(m, 8)
    m_pad = _round_up(m, tm)
    if m_pad != m:
        x = jnp.pad(x, ((0, m_pad - m), (0, 0)))
    flops = 2 * m_pad * k * n
    bytes_acc = m_pad * k * 2 + k * n * 2 + m_pad * n * 2 + n * 4
    out = pl.pallas_call(
        _linear_kernel,
        out_shape=jax.ShapeDtypeStruct((m_pad, n), jnp.bfloat16),
        grid_spec=pltpu.PrefetchScalarGridSpec(
            num_scalar_prefetch=0,
            grid=(m_pad // tm,),
            in_specs=[
                pl.BlockSpec((tm, k), lambda i: (i, 0)),
                pl.BlockSpec((k, n), lambda i: (0, 0)),
                pl.BlockSpec((1, n), lambda i: (0, 0)),
            ],
            out_specs=pl.BlockSpec((tm, n), lambda i: (i, 0)),
        ),
        compiler_params=pltpu.CompilerParams(
            dimension_semantics=("parallel",), vmem_limit_bytes=_VMEM_LIMIT),
        cost_estimate=pl.CostEstimate(
            flops=flops, transcendentals=0, bytes_accessed=bytes_acc),
    )(x, w, b)
    return out[:m]


# ----------------------------------------------------------------------------
# Kernel 2: fused LayerNorm + QKV projection (single wide (E,3E) matmul)
#   outputs: q [B,Sp,E], kT [B,E,Sp] (pre-transposed), v [B,Sp,E]  -- lane-dense
# ----------------------------------------------------------------------------
def _ln_qkv_kernel(x_ref, g_ref, bln_ref, wqkv_ref, bqkv_ref,
                   q_ref, kT_ref, v_ref, *, eps, embed_dim):
    y = _layernorm_f32(x_ref[0], g_ref[...], bln_ref[...], eps).astype(jnp.bfloat16)
    # one wide MXU pass (N = 3E) amortizes weight push / result-FIFO drains
    qkv = jnp.dot(y, wqkv_ref[...], preferred_element_type=jnp.float32) + bqkv_ref[...]
    E = embed_dim
    q_ref[0] = qkv[:, :E].astype(q_ref.dtype)
    # K stored pre-transposed so the attention score matmul needs no XLU transpose
    kT_ref[0] = qkv[:, E:2 * E].T.astype(kT_ref.dtype)
    v_ref[0] = qkv[:, 2 * E:].astype(v_ref.dtype)


def pallas_ln_qkv(xseq, g, bln, wqkv, bqkv, *, eps=1e-6):
    B, Sp, E = xseq.shape
    tq = _pick_tile(Sp, 256)
    vec_spec = pl.BlockSpec((1, E), lambda b, s: (0, 0))
    flops = 2 * B * Sp * E * 3 * E
    bytes_acc = 4 * B * Sp * E * 2 + 3 * E * E * 2 + 3 * E * 4
    return pl.pallas_call(
        functools.partial(_ln_qkv_kernel, eps=eps, embed_dim=E),
        out_shape=(
            jax.ShapeDtypeStruct((B, Sp, E), jnp.bfloat16),   # q
            jax.ShapeDtypeStruct((B, E, Sp), jnp.bfloat16),   # k^T
            jax.ShapeDtypeStruct((B, Sp, E), jnp.bfloat16),   # v
        ),
        grid_spec=pltpu.PrefetchScalarGridSpec(
            num_scalar_prefetch=0,
            grid=(B, Sp // tq),
            in_specs=[
                pl.BlockSpec((1, tq, E), lambda b, s: (b, s, 0)),
                vec_spec, vec_spec,
                pl.BlockSpec((E, 3 * E), lambda b, s: (0, 0)),
                pl.BlockSpec((1, 3 * E), lambda b, s: (0, 0)),
            ],
            out_specs=[
                pl.BlockSpec((1, tq, E), lambda b, s: (b, s, 0)),
                pl.BlockSpec((1, E, tq), lambda b, s: (b, 0, s)),
                pl.BlockSpec((1, tq, E), lambda b, s: (b, s, 0)),
            ],
        ),
        compiler_params=pltpu.CompilerParams(
            dimension_semantics=("parallel", "parallel"),
            vmem_limit_bytes=_VMEM_LIMIT),
        cost_estimate=pl.CostEstimate(
            flops=flops, transcendentals=B * Sp, bytes_accessed=bytes_acc),
    )(xseq, g, bln, wqkv, bqkv)


# ----------------------------------------------------------------------------
# Kernel 3: fused attention + output projection + residual add
#   grid = (batch, query_tile), both "parallel"; static in-kernel loop over heads;
#   one wide (tq,E)@(E,E) projection matmul per grid step.
# ----------------------------------------------------------------------------
def _attn_proj_kernel(q_ref, kT_ref, v_ref, wp_ref, bp_ref, res_ref, o_ref,
                      *, scale, seq_len, num_heads, head_dim):
    q = q_ref[0]        # (tq, E)   bf16
    kT = kT_ref[0]      # (E, Sp)   bf16 (pre-transposed K)
    v = v_ref[0]        # (Sp, E)   bf16
    sp = kT.shape[-1]

    ctx_heads = []
    for h in range(num_heads):        # small static loop (6 heads at real scale)
        lo = h * head_dim
        q_h = q[:, lo:lo + head_dim]              # (tq, Dh)
        kT_h = kT[lo:lo + head_dim, :]            # (Dh, Sp)  sublane-dim slice (cheap)
        s = jnp.dot(q_h, kT_h, preferred_element_type=jnp.float32) * scale
        if seq_len < sp:              # static check: mask padded key positions
            key_idx = lax.broadcasted_iota(jnp.int32, s.shape, 1)
            s = jnp.where(key_idx < seq_len, s, -1e30)
        m = jnp.max(s, axis=-1, keepdims=True)
        p = jnp.exp(s - m)
        p = p * pl.reciprocal(jnp.sum(p, axis=-1, keepdims=True), approx=True)
        ctx_heads.append(
            jnp.dot(p.astype(v.dtype), v[:, lo:lo + head_dim],
                    preferred_element_type=jnp.float32))
    ctx = jnp.concatenate(ctx_heads, axis=-1).astype(jnp.bfloat16)   # (tq, E)

    out = jnp.dot(ctx, wp_ref[...], preferred_element_type=jnp.float32) + bp_ref[...]
    o_ref[0] = (res_ref[0].astype(jnp.float32) + out).astype(o_ref.dtype)


def pallas_attn_proj(q, kT, v, wproj, bproj, residual, *, scale, seq_len,
                     num_heads):
    B, Sp, E = q.shape
    Dh = E // num_heads
    tq = _pick_tile(Sp, 128)          # query tiling keeps score tile small
    flops = B * (4 * Sp * Sp * E + 2 * Sp * E * E)
    bytes_acc = 3 * B * Sp * E * 2 + 2 * B * Sp * E * 2 + E * E * 2 + E * 4
    return pl.pallas_call(
        functools.partial(_attn_proj_kernel, scale=scale, seq_len=seq_len,
                          num_heads=num_heads, head_dim=Dh),
        out_shape=jax.ShapeDtypeStruct((B, Sp, E), jnp.bfloat16),
        grid_spec=pltpu.PrefetchScalarGridSpec(
            num_scalar_prefetch=0,
            grid=(B, Sp // tq),
            in_specs=[
                pl.BlockSpec((1, tq, E), lambda b, qi: (b, qi, 0)),
                pl.BlockSpec((1, E, Sp), lambda b, qi: (b, 0, 0)),
                pl.BlockSpec((1, Sp, E), lambda b, qi: (b, 0, 0)),
                pl.BlockSpec((E, E), lambda b, qi: (0, 0)),
                pl.BlockSpec((1, E), lambda b, qi: (0, 0)),
                pl.BlockSpec((1, tq, E), lambda b, qi: (b, qi, 0)),
            ],
            out_specs=pl.BlockSpec((1, tq, E), lambda b, qi: (b, qi, 0)),
        ),
        compiler_params=pltpu.CompilerParams(
            dimension_semantics=("parallel", "parallel"),
            vmem_limit_bytes=_VMEM_LIMIT),
        cost_estimate=pl.CostEstimate(
            flops=flops, transcendentals=B * num_heads * Sp * Sp,
            bytes_accessed=bytes_acc),
    )(q, kT, v, wproj, bproj, residual)


# ----------------------------------------------------------------------------
# Kernel 4: fused LayerNorm + fc1 + GELU + fc2 + residual add (MLP branch)
# ----------------------------------------------------------------------------
def _mlp_kernel(x_ref, g_ref, bln_ref, w1_ref, b1_ref, w2_ref, b2_ref, o_ref,
                *, eps):
    x = x_ref[...]
    y = _layernorm_f32(x, g_ref[...], bln_ref[...], eps).astype(jnp.bfloat16)
    h1 = jnp.dot(y, w1_ref[...], preferred_element_type=jnp.float32) + b1_ref[...]
    # TODO(synk): timm ViT uses exact (erf) GELU; tanh approximation used here.
    h1 = jax.nn.gelu(h1, approximate=True).astype(jnp.bfloat16)
    h2 = jnp.dot(h1, w2_ref[...], preferred_element_type=jnp.float32) + b2_ref[...]
    o_ref[...] = (x.astype(jnp.float32) + h2).astype(o_ref.dtype)


def pallas_mlp(x, g, bln, w1, b1, w2, b2, eps=1e-6):
    m, e = x.shape
    hid = w1.shape[1]
    tm = _pick_tile(m, 256)   # keep <= 256: f32 h1 intermediate fits v7x VMEM budget
    flops = 4 * m * e * hid
    bytes_acc = 2 * m * e * 2 + 2 * e * hid * 2 + (hid + 3 * e) * 4
    vec_e = pl.BlockSpec((1, e), lambda i: (0, 0))
    return pl.pallas_call(
        functools.partial(_mlp_kernel, eps=eps),
        out_shape=jax.ShapeDtypeStruct((m, e), jnp.bfloat16),
        grid_spec=pltpu.PrefetchScalarGridSpec(
            num_scalar_prefetch=0,
            grid=(m // tm,),
            in_specs=[
                pl.BlockSpec((tm, e), lambda i: (i, 0)),
                vec_e, vec_e,
                pl.BlockSpec((e, hid), lambda i: (0, 0)),
                pl.BlockSpec((1, hid), lambda i: (0, 0)),
                pl.BlockSpec((hid, e), lambda i: (0, 0)),
                vec_e,
            ],
            out_specs=pl.BlockSpec((tm, e), lambda i: (i, 0)),
        ),
        compiler_params=pltpu.CompilerParams(
            dimension_semantics=("parallel",), vmem_limit_bytes=_VMEM_LIMIT),
        cost_estimate=pl.CostEstimate(
            flops=flops, transcendentals=m * hid, bytes_accessed=bytes_acc),
    )(x, g, bln, w1, b1, w2, b2)


# ----------------------------------------------------------------------------
# Kernel 5: final LayerNorm (cls rows only) + classification head
#   rows padded to a multiple of 8, output lane-padded to a multiple of 128
# ----------------------------------------------------------------------------
def _ln_head_kernel(x_ref, g_ref, b_ref, w_ref, bias_ref, o_ref, *, eps):
    y = _layernorm_f32(x_ref[...], g_ref[...], b_ref[...], eps).astype(jnp.bfloat16)
    o_ref[...] = (jnp.dot(y, w_ref[...], preferred_element_type=jnp.float32)
                  + bias_ref[...]).astype(o_ref.dtype)


def pallas_ln_head(x, g, b, w, bias, eps=1e-6):
    m, e = x.shape
    n = w.shape[1]
    m_pad = _round_up(m, 8)
    if m_pad != m:
        x = jnp.pad(x, ((0, m_pad - m), (0, 0)))
    out = pl.pallas_call(
        functools.partial(_ln_head_kernel, eps=eps),
        out_shape=jax.ShapeDtypeStruct((m_pad, n), jnp.float32),
        grid_spec=pltpu.PrefetchScalarGridSpec(
            num_scalar_prefetch=0,
            grid=(1,),
            in_specs=[
                pl.BlockSpec((m_pad, e), lambda i: (0, 0)),
                pl.BlockSpec((1, e), lambda i: (0, 0)),
                pl.BlockSpec((1, e), lambda i: (0, 0)),
                pl.BlockSpec((e, n), lambda i: (0, 0)),
                pl.BlockSpec((1, n), lambda i: (0, 0)),
            ],
            out_specs=pl.BlockSpec((m_pad, n), lambda i: (0, 0)),
        ),
        compiler_params=pltpu.CompilerParams(
            dimension_semantics=("arbitrary",), vmem_limit_bytes=_VMEM_LIMIT),
    )(x, g, b, w, bias)
    return out[:m]


# ----------------------------------------------------------------------------
# Parameter construction (deterministic, synthetic -- no checkpoint load)
# ----------------------------------------------------------------------------
def init_vit_params(key, *, in_chans, patch, embed_dim, depth, num_heads,
                    mlp_ratio, num_patches, output_dim):
    keys = iter(jax.random.split(key, 8 + depth * 8))
    std = 0.02
    bf16 = jnp.bfloat16
    hidden = int(embed_dim * mlp_ratio)
    out_pad = _round_up(output_dim, 128)

    def nrm(shape):
        return jax.random.normal(next(keys), shape, jnp.float32) * std

    head_w = jnp.pad(nrm((embed_dim, output_dim)),
                     ((0, 0), (0, out_pad - output_dim)))

    params = {
        # conv weight [E, C, p, p] flattened to a linear [C*p*p, E]
        "patch_w": nrm((in_chans * patch * patch, embed_dim)).astype(bf16),
        "patch_b": jnp.zeros((1, embed_dim), jnp.float32),
        "cls_token": nrm((1, 1, embed_dim)),
        "pos_embed": nrm((1, num_patches + 1, embed_dim)),
        "norm_g": jnp.ones((1, embed_dim), jnp.float32),
        "norm_b": jnp.zeros((1, embed_dim), jnp.float32),
        "head_w": head_w.astype(bf16),
        "head_b": jnp.zeros((1, out_pad), jnp.float32),
        "blocks": [],
    }
    for _ in range(depth):
        blk = {
            "ln1_g": jnp.ones((1, embed_dim), jnp.float32),
            "ln1_b": jnp.zeros((1, embed_dim), jnp.float32),
            # fused QKV weight: one (E, 3E) matmul per tile
            "wqkv": nrm((embed_dim, 3 * embed_dim)).astype(bf16),
            "bqkv": jnp.zeros((1, 3 * embed_dim), jnp.float32),
            "proj_w": nrm((embed_dim, embed_dim)).astype(bf16),
            "proj_b": jnp.zeros((1, embed_dim), jnp.float32),
            "ln2_g": jnp.ones((1, embed_dim), jnp.float32),
            "ln2_b": jnp.zeros((1, embed_dim), jnp.float32),
            "fc1_w": nrm((embed_dim, hidden)).astype(bf16),
            "fc1_b": jnp.zeros((1, hidden), jnp.float32),
            "fc2_w": nrm((hidden, embed_dim)).astype(bf16),
            "fc2_b": jnp.zeros((1, embed_dim), jnp.float32),
        }
        params["blocks"].append(blk)
    return params


# ----------------------------------------------------------------------------
# Forward pass (glue in JAX, hot path in fused Pallas kernels)
# ----------------------------------------------------------------------------
def vit_forward(params, x, *, patch, num_heads, output_dim):
    B, C, H, W = x.shape
    E = params["patch_w"].shape[1]
    Hp, Wp = H // patch, W // patch
    N = Hp * Wp
    S = N + 1
    Sp = _round_up(S, 8) if S <= 128 else _round_up(S, 128)
    Dh = E // num_heads
    scale = Dh ** -0.5
    dt = jnp.bfloat16

    # --- patch embed: conv(kernel=stride=patch) == tiled linear over flat patches
    patches = x.reshape(B, C, Hp, patch, Wp, patch)
    patches = patches.transpose(0, 2, 4, 1, 3, 5).reshape(B * N, C * patch * patch)
    tokens = pallas_linear(patches.astype(dt), params["patch_w"], params["patch_b"])
    tokens = tokens.reshape(B, N, E).astype(jnp.float32)

    # --- cls token + positional embedding; pad sequence to TPU-friendly Sp
    cls = jnp.broadcast_to(params["cls_token"], (B, 1, E))
    xseq = jnp.concatenate([cls, tokens], axis=1) + params["pos_embed"]
    xseq = jnp.pad(xseq, ((0, 0), (0, Sp - S), (0, 0))).astype(dt)

    # --- transformer blocks: 3 fused kernels per block
    for blk in params["blocks"]:
        q, kT, v = pallas_ln_qkv(xseq, blk["ln1_g"], blk["ln1_b"],
                                 blk["wqkv"], blk["bqkv"])
        xseq = pallas_attn_proj(q, kT, v, blk["proj_w"], blk["proj_b"],
                                xseq, scale=scale, seq_len=S,
                                num_heads=num_heads)
        xseq = pallas_mlp(xseq.reshape(B * Sp, E), blk["ln2_g"], blk["ln2_b"],
                          blk["fc1_w"], blk["fc1_b"],
                          blk["fc2_w"], blk["fc2_b"]).reshape(B, Sp, E)

    # --- final norm on cls rows only + classification head (padded, then sliced)
    cls_feat = xseq[:, 0, :]
    logits = pallas_ln_head(cls_feat, params["norm_g"], params["norm_b"],
                            params["head_w"], params["head_b"])
    return logits[:, :output_dim]


# ----------------------------------------------------------------------------
if __name__ == "__main__":
    # Small, architecture-consistent shapes (real vit_small: 224/16/384/12/6).
    B, C, IMG, PATCH = 2, 3, 16, 8
    EMBED, DEPTH, HEADS, MLP_RATIO = 32, 2, 4, 4.0
    OUTPUT_DIM = 10
    NUM_PATCHES = (IMG // PATCH) ** 2

    key = jax.random.PRNGKey(0)
    pkey, xkey = jax.random.split(key)
    params = init_vit_params(
        pkey, in_chans=C, patch=PATCH, embed_dim=EMBED, depth=DEPTH,
        num_heads=HEADS, mlp_ratio=MLP_RATIO, num_patches=NUM_PATCHES,
        output_dim=OUTPUT_DIM)

    x = jax.random.normal(xkey, (B, C, IMG, IMG), jnp.float32)   # NCHW like PyTorch

    fwd = jax.jit(functools.partial(vit_forward, patch=PATCH, num_heads=HEADS,
                                    output_dim=OUTPUT_DIM))
    logits = fwd(params, x)
    jax.block_until_ready(logits)
    assert logits.shape == (B, OUTPUT_DIM)
    assert bool(jnp.all(jnp.isfinite(logits)))
    print("KERNEL_OK")
</pallas_src>

<mosaic_0001>
module attributes {stable_mosaic.version = 11 : i64} {
  func.func @_linear_kernel(%arg0: i32, %arg1: memref<8x192xbf16, #tpu.memory_space<vmem>>, %arg2: memref<192x32xbf16, #tpu.memory_space<vmem>>, %arg3: memref<1x32xf32, #tpu.memory_space<vmem>>, %arg4: memref<8x32xbf16, #tpu.memory_space<vmem>>) attributes {dimension_semantics = [#tpu.dimension_semantics<parallel>], iteration_bounds = array<i64: 1>, scalar_prefetch = 0 : i64, scratch_operands = 0 : i64, tpu.core_type = #tpu.core_type<tc>, window_params = [{transform_indices = @transform_0, window_bounds = array<i64: 8, 192>}, {pipeline_mode = #tpu.pipeline_mode<synchronous>, transform_indices = @transform_1, window_bounds = array<i64: 192, 32>}, {pipeline_mode = #tpu.pipeline_mode<synchronous>, transform_indices = @transform_2, window_bounds = array<i64: 1, 32>}, {transform_indices = @transform_3, window_bounds = array<i64: 8, 32>}]} {
    %c0 = arith.constant 0 : index
    %c0_0 = arith.constant 0 : index
    %0 = vector.load %arg1[%c0, %c0_0] : memref<8x192xbf16, #tpu.memory_space<vmem>>, vector<8x192xbf16>
    %c0_1 = arith.constant 0 : index
    %c0_2 = arith.constant 0 : index
    %1 = vector.load %arg2[%c0_1, %c0_2] : memref<192x32xbf16, #tpu.memory_space<vmem>>, vector<192x32xbf16>
    %cst = arith.constant dense<0.000000e+00> : vector<8x32xf32>
    %2 = tpu.matmul %0, %1, %cst {dimension_numbers = #tpu.dot_dimension_numbers<[1], [0], [0], [1], [0, 0, 1, 1], [], []>} : vector<8x192xbf16>, vector<192x32xbf16>, vector<8x32xf32> -> vector<8x32xf32>
    %c0_3 = arith.constant 0 : index
    %c0_4 = arith.constant 0 : index
    %3 = vector.load %arg3[%c0_3, %c0_4] : memref<1x32xf32, #tpu.memory_space<vmem>>, vector<1x32xf32>
    %4 = vector.broadcast %3 : vector<1x32xf32> to vector<8x32xf32>
    %5 = arith.addf %2, %4 : vector<8x32xf32>
    %6 = arith.truncf %5 : vector<8x32xf32> to vector<8x32xbf16>
    %c0_5 = arith.constant 0 : index
    %c0_6 = arith.constant 0 : index
    %7 = vector.load %arg4[%c0_5, %c0_6] : memref<8x32xbf16, #tpu.memory_space<vmem>>, vector<8x32xbf16>
    tpu.vector_store %arg4[%c0_5, %c0_6], %6 {strides = array<i32>} : memref<8x32xbf16, #tpu.memory_space<vmem>>, vector<8x32xbf16>,
    return
  }
  func.func @transform_0(%arg0: i32) -> (i32, i32) {
    %c0_i32 = arith.constant 0 : i32
    %c0_i32_0 = arith.constant 0 : i32
    return %arg0, %c0_i32 : i32, i32
  }
  func.func @transform_1(%arg0: i32) -> (i32, i32) {
    %c0_i32 = arith.constant 0 : i32
    %c0_i32_0 = arith.constant 0 : i32
    %c0_i32_1 = arith.constant 0 : i32
    return %c0_i32, %c0_i32_0 : i32, i32
  }
  func.func @transform_2(%arg0: i32) -> (i32, i32) {
    %c0_i32 = arith.constant 0 : i32
    %c0_i32_0 = arith.constant 0 : i32
    %c0_i32_1 = arith.constant 0 : i32
    return %c0_i32, %c0_i32_0 : i32, i32
  }
  func.func @transform_3(%arg0: i32) -> (i32, i32) {
    %c0_i32 = arith.constant 0 : i32
    %c0_i32_0 = arith.constant 0 : i32
    return %arg0, %c0_i32 : i32, i32
  }
}

module attributes {stable_mosaic.version = 11 : i64} {
  func.func @_attn_proj_kernel(%arg0: i32, %arg1: i32, %arg2: memref<1x8x32xbf16, #tpu.memory_space<vmem>>, %arg3: memref<1x32x8xbf16, #tpu.memory_space<vmem>>, %arg4: memref<1x8x32xbf16, #tpu.memory_space<vmem>>, %arg5: memref<32x32xbf16, #tpu.memory_space<vmem>>, %arg6: memref<1x32xf32, #tpu.memory_space<vmem>>, %arg7: memref<1x8x32xbf16, #tpu.memory_space<vmem>>, %arg8: memref<1x8x32xbf16, #tpu.memory_space<vmem>>) attributes {dimension_semantics = [#tpu.dimension_semantics<parallel>, #tpu.dimension_semantics<parallel>], iteration_bounds = array<i64: 2, 1>, scalar_prefetch = 0 : i64, scratch_operands = 0 : i64, tpu.core_type = #tpu.core_type<tc>, window_params = [{transform_indices = @transform_0, window_bounds = array<i64: 1, 8, 32>}, {transform_indices = @transform_1, window_bounds = array<i64: 1, 32, 8>}, {transform_indices = @transform_2, window_bounds = array<i64: 1, 8, 32>}, {pipeline_mode = #tpu.pipeline_mode<synchronous>, transform_indices = @transform_3, window_bounds = array<i64: 32, 32>}, {pipeline_mode = #tpu.pipeline_mode<synchronous>, transform_indices = @transform_4, window_bounds = array<i64: 1, 32>}, {transform_indices = @transform_5, window_bounds = array<i64: 1, 8, 32>}, {transform_indices = @transform_6, window_bounds = array<i64: 1, 8, 32>}]} {
    %c0 = arith.constant 0 : index
    %c0_0 = arith.constant 0 : index
    %c0_1 = arith.constant 0 : index
    %0 = vector.load %arg2[%c0, %c0_0, %c0_1] : memref<1x8x32xbf16, #tpu.memory_space<vmem>>, vector<1x8x32xbf16>
    %1 = vector.shape_cast %0 : vector<1x8x32xbf16> to vector<8x32xbf16>
    %c0_2 = arith.constant 0 : index
    %c0_3 = arith.constant 0 : index
    %c0_4 = arith.constant 0 : index
    %2 = vector.load %arg3[%c0_2, %c0_3, %c0_4] : memref<1x32x8xbf16, #tpu.memory_space<vmem>>, vector<1x32x8xbf16>
    %3 = vector.shape_cast %2 : vector<1x32x8xbf16> to vector<32x8xbf16>
    %c0_5 = arith.constant 0 : index
    %c0_6 = arith.constant 0 : index
    %c0_7 = arith.constant 0 : index
    %4 = vector.load %arg4[%c0_5, %c0_6, %c0_7] : memref<1x8x32xbf16, #tpu.memory_space<vmem>>, vector<1x8x32xbf16>
    %5 = vector.shape_cast %4 : vector<1x8x32xbf16> to vector<8x32xbf16>
    %6 = vector.extract_strided_slice %1 {offsets = [0, 0], sizes = [8, 8], strides = [1, 1]} : vector<8x32xbf16> to vector<8x8xbf16>
    %7 = vector.extract_strided_slice %3 {offsets = [0, 0], sizes = [8, 8], strides = [1, 1]} : vector<32x8xbf16> to vector<8x8xbf16>
    %cst = arith.constant dense<0.000000e+00> : vector<8x8xf32>
    %8 = tpu.matmul %6, %7, %cst {dimension_numbers = #tpu.dot_dimension_numbers<[1], [0], [0], [1], [0, 0, 1, 1], [], []>} : vector<8x8xbf16>, vector<8x8xbf16>, vector<8x8xf32> -> vector<8x8xf32>
    %cst_8 = arith.constant 0.353553385 : f32
    %9 = vector.broadcast %cst_8 : f32 to vector<8x8xf32>
    %10 = arith.mulf %8, %9 : vector<8x8xf32>
    %11 = tpu.iota {dimensions = array<i32: 1>} : vector<8x8xi32>
    %c5_i32 = arith.constant 5 : i32
    %12 = vector.broadcast %c5_i32 : i32 to vector<8x8xi32>
    %13 = arith.cmpi slt, %11, %12 : vector<8x8xi32>
    %cst_9 = arith.constant -1.000000e+30 : f32
    %14 = vector.broadcast %cst_9 : f32 to vector<8x8xf32>
    %15 = arith.select %13, %10, %14 : vector<8x8xi1>, vector<8x8xf32>
    %cst_10 = arith.constant dense<0xFF800000> : vector<8xf32>
    %16 = vector.multi_reduction <maximumf>, %15, %cst_10 [1] : vector<8x8xf32> to vector<8xf32>
    %17 = vector.shape_cast %16 : vector<8xf32> to vector<8x1xf32>
    %18 = vector.broadcast %17 : vector<8x1xf32> to vector<8x8xf32>
    %19 = arith.subf %15, %18 : vector<8x8xf32>
    %20 = math.exp %19 : vector<8x8xf32>
    %cst_11 = arith.constant dense<0.000000e+00> : vector<8xf32>
    %21 = vector.multi_reduction <add>, %20, %cst_11 [1] : vector<8x8xf32> to vector<8xf32>
    %22 = vector.shape_cast %21 : vector<8xf32> to vector<8x1xf32>
    %23 = tpu.reciprocal %22 {approx = true} : vector<8x1xf32> -> vector<8x1xf32>
    %24 = vector.broadcast %23 : vector<8x1xf32> to vector<8x8xf32>
    %25 = arith.mulf %20, %24 : vector<8x8xf32>
    %26 = arith.truncf %25 : vector<8x8xf32> to vector<8x8xbf16>
    %27 = vector.extract_strided_slice %5 {offsets = [0, 0], sizes = [8, 8], strides = [1, 1]} : vector<8x32xbf16> to vector<8x8xbf16>
    %cst_12 = arith.constant dense<0.000000e+00> : vector<8x8xf32>
    %28 = tpu.matmul %26, %27, %cst_12 {dimension_numbers = #tpu.dot_dimension_numbers<[1], [0], [0], [1], [0, 0, 1, 1], [], []>} : vector<8x8xbf16>, vector<8x8xbf16>, vector<8x8xf32> -> vector<8x8xf32>
    %29 = vector.extract_strided_slice %1 {offsets = [0, 8], sizes = [8, 8], strides = [1, 1]} : vector<8x32xbf16> to vector<8x8xbf16>
    %30 = vector.extract_strided_slice %3 {offsets = [8, 0], sizes = [8, 8], strides = [1, 1]} : vector<32x8xbf16> to vector<8x8xbf16>
    %cst_13 = arith.constant dense<0.000000e+00> : vector<8x8xf32>
    %31 = tpu.matmul %29, %30, %cst_13 {dimension_numbers = #tpu.dot_dimension_numbers<[1], [0], [0], [1], [0, 0, 1, 1], [], []>} : vector<8x8xbf16>, vector<8x8xbf16>, vector<8x8xf32> -> vector<8x8xf32>
    %cst_14 = arith.constant 0.353553385 : f32
    %32 = vector.broadcast %cst_14 : f32 to vector<8x8xf32>
    %33 = arith.mulf %31, %32 : vector<8x8xf32>
    %34 = tpu.iota {dimensions = array<i32: 1>} : vector<8x8xi32>
    %c5_i32_15 = arith.constant 5 : i32
    %35 = vector.broadcast %c5_i32_15 : i32 to vector<8x8xi32>
    %36 = arith.cmpi slt, %34, %35 : vector<8x8xi32>
    %cst_16 = arith.constant -1.000000e+30 : f32
    %37 = vector.broadcast %cst_16 : f32 to vector<8x8xf32>
    %38 = arith.select %36, %33, %37 : vector<8x8xi1>, vector<8x8xf32>
    %cst_17 = arith.constant dense<0xFF800000> : vector<8xf32>
    %39 = vector.multi_reduction <maximumf>, %38, %cst_17 [1] : vector<8x8xf32> to vector<8xf32>
    %40 = vector.shape_cast %39 : vector<8xf32> to vector<8x1xf32>
    %41 = vector.broadcast %40 : vector<8x1xf32> to vector<8x8xf32>
    %42 = arith.subf %38, %41 : vector<8x8xf32>
    %43 = math.exp %42 : vector<8x8xf32>
    %cst_18 = arith.constant dense<0.000000e+00> : vector<8xf32>
    %44 = vector.multi_reduction <add>, %43, %cst_18 [1] : vector<8x8xf32> to vector<8xf32>
    %45 = vector.shape_cast %44 : vector<8xf32> to vector<8x1xf32>
    %46 = tpu.reciprocal %45 {approx = true} : vector<8x1xf32> -> vector<8x1xf32>
    %47 = vector.broadcast %46 : vector<8x1xf32> to vector<8x8xf32>
    %48 = arith.mulf %43, %47 : vector<8x8xf32>
    %49 = arith.truncf %48 : vector<8x8xf32> to vector<8x8xbf16>
    %50 = vector.extract_strided_slice %5 {offsets = [0, 8], sizes = [8, 8], strides = [1, 1]} : vector<8x32xbf16> to vector<8x8xbf16>
    %cst_19 = arith.constant dense<0.000000e+00> : vector<8x8xf32>
    %51 = tpu.matmul %49, %50, %cst_19 {dimension_numbers = #tpu.dot_dimension_numbers<[1], [0], [0], [1], [0, 0, 1, 1], [], []>} : vector<8x8xbf16>, vector<8x8xbf16>, vector<8x8xf32> -> vector<8x8xf32>
    %52 = vector.extract_strided_slice %1 {offsets = [0, 16], sizes = [8, 8], strides = [1, 1]} : vector<8x32xbf16> to vector<8x8xbf16>
    %53 = vector.extract_strided_slice %3 {offsets = [16, 0], sizes = [8, 8], strides = [1, 1]} : vector<32x8xbf16> to vector<8x8xbf16>
    %cst_20 = arith.constant dense<0.000000e+00> : vector<8x8xf32>
    %54 = tpu.matmul %52, %53, %cst_20 {dimension_numbers = #tpu.dot_dimension_numbers<[1], [0], [0], [1], [0, 0, 1, 1], [], []>} : vector<8x8xbf16>, vector<8x8xbf16>, vector<8x8xf32> -> vector<8x8xf32>
    %cst_21 = arith.constant 0.353553385 : f32
    %55 = vector.broadcast %cst_21 : f32 to vector<8x8xf32>
    %56 = arith.mulf %54, %55 : vector<8x8xf32>
    %57 = tpu.iota {dimensions = array<i32: 1>} : vector<8x8xi32>
    %c5_i32_22 = arith.constant 5 : i32
    %58 = vector.broadcast %c5_i32_22 : i32 to vector<8x8xi32>
    %59 = arith.cmpi slt, %57, %58 : vector<8x8xi32>
    %cst_23 = arith.constant -1.000000e+30 : f32
    %60 = vector.broadcast %cst_23 : f32 to vector<8x8xf32>
    %61 = arith.select %59, %56, %60 : vector<8x8xi1>, vector<8x8xf32>
    %cst_24 = arith.constant dense<0xFF800000> : vector<8xf32>
    %62 = vector.multi_reduction <maximumf>, %61, %cst_24 [1] : vector<8x8xf32> to vector<8xf32>
    %63 = vector.shape_cast %62 : vector<8xf32> to vector<8x1xf32>
    %64 = vector.broadcast %63 : vector<8x1xf32> to vector<8x8xf32>
    %65 = arith.subf %61, %64 : vector<8x8xf32>
    %66 = math.exp %65 : vector<8x8xf32>
    %cst_25 = arith.constant dense<0.000000e+00> : vector<8xf32>
    %67 = vector.multi_reduction <add>, %66, %cst_25 [1] : vector<8x8xf32> to vector<8xf32>
    %68 = vector.shape_cast %67 : vector<8xf32> to vector<8x1xf32>
    %69 = tpu.reciprocal %68 {approx = true} : vector<8x1xf32> -> vector<8x1xf32>
    %70 = vector.broadcast %69 : vector<8x1xf32> to vector<8x8xf32>
    %71 = arith.mulf %66, %70 : vector<8x8xf32>
    %72 = arith.truncf %71 : vector<8x8xf32> to vector<8x8xbf16>
    %73 = vector.extract_strided_slice %5 {offsets = [0, 16], sizes = [8, 8], strides = [1, 1]} : vector<8x32xbf16> to vector<8x8xbf16>
    %cst_26 = arith.constant dense<0.000000e+00> : vector<8x8xf32>
    %74 = tpu.matmul %72, %73, %cst_26 {dimension_numbers = #tpu.dot_dimension_numbers<[1], [0], [0], [1], [0, 0, 1, 1], [], []>} : vector<8x8xbf16>, vector<8x8xbf16>, vector<8x8xf32> -> vector<8x8xf32>
    %75 = vector.extract_strided_slice %1 {offsets = [0, 24], sizes = [8, 8], strides = [1, 1]} : vector<8x32xbf16> to vector<8x8xbf16>
    %76 = vector.extract_strided_slice %3 {offsets = [24, 0], sizes = [8, 8], strides = [1, 1]} : vector<32x8xbf16> to vector<8x8xbf16>
    %cst_27 = arith.constant dense<0.000000e+00> : vector<8x8xf32>
    %77 = tpu.matmul %75, %76, %cst_27 {dimension_numbers = #tpu.dot_dimension_numbers<[1], [0], [0], [1], [0, 0, 1, 1], [], []>} : vector<8x8xbf16>, vector<8x8xbf16>, vector<8x8xf32> -> vector<8x8xf32>
    %cst_28 = arith.constant 0.353553385 : f32
    %78 = vector.broadcast %cst_28 : f32 to vector<8x8xf32>
    %79 = arith.mulf %77, %78 : vector<8x8xf32>
    %80 = tpu.iota {dimensions = array<i32: 1>} : vector<8x8xi32>
    %c5_i32_29 = arith.constant 5 : i32
    %81 = vector.broadcast %c5_i32_29 : i32 to vector<8x8xi32>
    %82 = arith.cmpi slt, %80, %81 : vector<8x8xi32>
    %cst_30 = arith.constant -1.000000e+30 : f32
    %83 = vector.broadcast %cst_30 : f32 to vector<8x8xf32>
    %84 = arith.select %82, %79, %83 : vector<8x8xi1>, vector<8x8xf32>
    %cst_31 = arith.constant dense<0xFF800000> : vector<8xf32>
    %85 = vector.multi_reduction <maximumf>, %84, %cst_31 [1] : vector<8x8xf32> to vector<8xf32>
    %86 = vector.shape_cast %85 : vector<8xf32> to vector<8x1xf32>
    %87 = vector.broadcast %86 : vector<8x1xf32> to vector<8x8xf32>
    %88 = arith.subf %84, %87 : vector<8x8xf32>
    %89 = math.exp %88 : vector<8x8xf32>
    %cst_32 = arith.constant dense<0.000000e+00> : vector<8xf32>
    %90 = vector.multi_reduction <add>, %89, %cst_32 [1] : vector<8x8xf32> to vector<8xf32>
    %91 = vector.shape_cast %90 : vector<8xf32> to vector<8x1xf32>
    %92 = tpu.reciprocal %91 {approx = true} : vector<8x1xf32> -> vector<8x1xf32>
    %93 = vector.broadcast %92 : vector<8x1xf32> to vector<8x8xf32>
    %94 = arith.mulf %89, %93 : vector<8x8xf32>
    %95 = arith.truncf %94 : vector<8x8xf32> to vector<8x8xbf16>
    %96 = vector.extract_strided_slice %5 {offsets = [0, 24], sizes = [8, 8], strides = [1, 1]} : vector<8x32xbf16> to vector<8x8xbf16>
    %cst_33 = arith.constant dense<0.000000e+00> : vector<8x8xf32>
    %97 = tpu.matmul %95, %96, %cst_33 {dimension_numbers = #tpu.dot_dimension_numbers<[1], [0], [0], [1], [0, 0, 1, 1], [], []>} : vector<8x8xbf16>, vector<8x8xbf16>, vector<8x8xf32> -> vector<8x8xf32>
    %98 = tpu.concatenate %28, %51, %74, %97 in 1 : vector<8x8xf32>, vector<8x8xf32>, vector<8x8xf32>, vector<8x8xf32> -> vector<8x32xf32>
    %99 = arith.truncf %98 : vector<8x32xf32> to vector<8x32xbf16>
    %c0_34 = arith.constant 0 : index
    %c0_35 = arith.constant 0 : index
    %100 = vector.load %arg5[%c0_34, %c0_35] : memref<32x32xbf16, #tpu.memory_space<vmem>>, vector<32x32xbf16>
    %cst_36 = arith.constant dense<0.000000e+00> : vector<8x32xf32>
    %101 = tpu.matmul %99, %100, %cst_36 {dimension_numbers = #tpu.dot_dimension_numbers<[1], [0], [0], [1], [0, 0, 1, 1], [], []>} : vector<8x32xbf16>, vector<32x32xbf16>, vector<8x32xf32> -> vector<8x32xf32>
    %c0_37 = arith.constant 0 : index
    %c0_38 = arith.constant 0 : index
    %102 = vector.load %arg6[%c0_37, %c0_38] : memref<1x32xf32, #tpu.memory_space<vmem>>, vector<1x32xf32>
    %103 = vector.broadcast %102 : vector<1x32xf32> to vector<8x32xf32>
    %104 = arith.addf %101, %103 : vector<8x32xf32>
    %c0_39 = arith.constant 0 : index
    %c0_40 = arith.constant 0 : index
    %c0_41 = arith.constant 0 : index
    %105 = vector.load %arg7[%c0_39, %c0_40, %c0_41] : memref<1x8x32xbf16, #tpu.memory_space<vmem>>, vector<1x8x32xbf16>
    %106 = vector.shape_cast %105 : vector<1x8x32xbf16> to vector<8x32xbf16>
    %107 = arith.extf %106 : vector<8x32xbf16> to vector<8x32xf32>
    %108 = arith.addf %107, %104 : vector<8x32xf32>
    %109 = arith.truncf %108 : vector<8x32xf32> to vector<8x32xbf16>
    %c0_42 = arith.constant 0 : index
    %c0_43 = arith.constant 0 : index
    %c0_44 = arith.constant 0 : index
    %110 = vector.load %arg8[%c0_42, %c0_43, %c0_44] : memref<1x8x32xbf16, #tpu.memory_space<vmem>>, vector<1x8x32xbf16>
    %111 = vector.shape_cast %110 : vector<1x8x32xbf16> to vector<8x32xbf16>
    %112 = vector.shape_cast %109 : vector<8x32xbf16> to vector<1x8x32xbf16>
    tpu.vector_store %arg8[%c0_42, %c0_43, %c0_44], %112 {strides = array<i32>} : memref<1x8x32xbf16, #tpu.memory_space<vmem>>, vector<1x8x32xbf16>,
    return
  }
  func.func @transform_0(%arg0: i32, %arg1: i32) -> (i32, i32, i32) {
    %c0_i32 = arith.constant 0 : i32
    %c0_i32_0 = arith.constant 0 : i32
    return %arg0, %arg1, %c0_i32 : i32, i32, i32
  }
  func.func @transform_1(%arg0: i32, %arg1: i32) -> (i32, i32, i32) {
    %c0_i32 = arith.constant 0 : i32
    %c0_i32_0 = arith.constant 0 : i32
    %c0_i32_1 = arith.constant 0 : i32
    return %arg0, %c0_i32, %c0_i32_0 : i32, i32, i32
  }
  func.func @transform_2(%arg0: i32, %arg1: i32) -> (i32, i32, i32) {
    %c0_i32 = arith.constant 0 : i32
    %c0_i32_0 = arith.constant 0 : i32
    %c0_i32_1 = arith.constant 0 : i32
    return %arg0, %c0_i32, %c0_i32_0 : i32, i32, i32
  }
  func.func @transform_3(%arg0: i32, %arg1: i32) -> (i32, i32) {
    %c0_i32 = arith.constant 0 : i32
    %c0_i32_0 = arith.constant 0 : i32
    %c0_i32_1 = arith.constant 0 : i32
    return %c0_i32, %c0_i32_0 : i32, i32
  }
  func.func @transform_4(%arg0: i32, %arg1: i32) -> (i32, i32) {
    %c0_i32 = arith.constant 0 : i32
    %c0_i32_0 = arith.constant 0 : i32
    %c0_i32_1 = arith.constant 0 : i32
    return %c0_i32, %c0_i32_0 : i32, i32
  }
  func.func @transform_5(%arg0: i32, %arg1: i32) -> (i32, i32, i32) {
    %c0_i32 = arith.constant 0 : i32
    %c0_i32_0 = arith.constant 0 : i32
    return %arg0, %arg1, %c0_i32 : i32, i32, i32
  }
  func.func @transform_6(%arg0: i32, %arg1: i32) -> (i32, i32, i32) {
    %c0_i32 = arith.constant 0 : i32
    %c0_i32_0 = arith.constant 0 : i32
    return %arg0, %arg1, %c0_i32 : i32, i32, i32
  }
}

module attributes {stable_mosaic.version = 11 : i64} {
  func.func @_ln_qkv_kernel(%arg0: i32, %arg1: i32, %arg2: memref<1x8x32xbf16, #tpu.memory_space<vmem>>, %arg3: memref<1x32xf32, #tpu.memory_space<vmem>>, %arg4: memref<1x32xf32, #tpu.memory_space<vmem>>, %arg5: memref<32x96xbf16, #tpu.memory_space<vmem>>, %arg6: memref<1x96xf32, #tpu.memory_space<vmem>>, %arg7: memref<1x8x32xbf16, #tpu.memory_space<vmem>>, %arg8: memref<1x32x8xbf16, #tpu.memory_space<vmem>>, %arg9: memref<1x8x32xbf16, #tpu.memory_space<vmem>>) attributes {dimension_semantics = [#tpu.dimension_semantics<parallel>, #tpu.dimension_semantics<parallel>], iteration_bounds = array<i64: 2, 1>, scalar_prefetch = 0 : i64, scratch_operands = 0 : i64, tpu.core_type = #tpu.core_type<tc>, window_params = [{transform_indices = @transform_0, window_bounds = array<i64: 1, 8, 32>}, {pipeline_mode = #tpu.pipeline_mode<synchronous>, transform_indices = @transform_1, window_bounds = array<i64: 1, 32>}, {pipeline_mode = #tpu.pipeline_mode<synchronous>, transform_indices = @transform_2, window_bounds = array<i64: 1, 32>}, {pipeline_mode = #tpu.pipeline_mode<synchronous>, transform_indices = @transform_3, window_bounds = array<i64: 32, 96>}, {pipeline_mode = #tpu.pipeline_mode<synchronous>, transform_indices = @transform_4, window_bounds = array<i64: 1, 96>}, {transform_indices = @transform_5, window_bounds = array<i64: 1, 8, 32>}, {transform_indices = @transform_6, window_bounds = array<i64: 1, 32, 8>}, {transform_indices = @transform_7, window_bounds = array<i64: 1, 8, 32>}]} {
    %c0 = arith.constant 0 : index
    %c0_0 = arith.constant 0 : index
    %c0_1 = arith.constant 0 : index
    %0 = vector.load %arg2[%c0, %c0_0, %c0_1] : memref<1x8x32xbf16, #tpu.memory_space<vmem>>, vector<1x8x32xbf16>
    %1 = vector.shape_cast %0 : vector<1x8x32xbf16> to vector<8x32xbf16>
    %c0_2 = arith.constant 0 : index
    %c0_3 = arith.constant 0 : index
    %2 = vector.load %arg3[%c0_2, %c0_3] : memref<1x32xf32, #tpu.memory_space<vmem>>, vector<1x32xf32>
    %c0_4 = arith.constant 0 : index
    %c0_5 = arith.constant 0 : index
    %3 = vector.load %arg4[%c0_4, %c0_5] : memref<1x32xf32, #tpu.memory_space<vmem>>, vector<1x32xf32>
    %4 = arith.extf %1 : vector<8x32xbf16> to vector<8x32xf32>
    %cst = arith.constant dense<0.000000e+00> : vector<8xf32>
    %5 = vector.multi_reduction <add>, %4, %cst [1] : vector<8x32xf32> to vector<8xf32>
    %6 = vector.shape_cast %5 : vector<8xf32> to vector<8x1xf32>
    %cst_6 = arith.constant 3.200000e+01 : f32
    %7 = vector.broadcast %cst_6 : f32 to vector<8x1xf32>
    %8 = arith.divf %6, %7 : vector<8x1xf32>
    %9 = vector.broadcast %8 : vector<8x1xf32> to vector<8x32xf32>
    %10 = arith.subf %4, %9 : vector<8x32xf32>
    %11 = arith.mulf %10, %10 : vector<8x32xf32>
    %cst_7 = arith.constant dense<0.000000e+00> : vector<8xf32>
    %12 = vector.multi_reduction <add>, %11, %cst_7 [1] : vector<8x32xf32> to vector<8xf32>
    %13 = vector.shape_cast %12 : vector<8xf32> to vector<8x1xf32>
    %cst_8 = arith.constant 3.200000e+01 : f32
    %14 = vector.broadcast %cst_8 : f32 to vector<8x1xf32>
    %15 = arith.divf %13, %14 : vector<8x1xf32>
    %16 = vector.broadcast %8 : vector<8x1xf32> to vector<8x32xf32>
    %17 = arith.subf %4, %16 : vector<8x32xf32>
    %cst_9 = arith.constant 9.99999997E-7 : f32
    %18 = vector.broadcast %cst_9 : f32 to vector<8x1xf32>
    %19 = arith.addf %15, %18 : vector<8x1xf32>
    %20 = math.rsqrt %19 : vector<8x1xf32>
    %21 = vector.broadcast %20 : vector<8x1xf32> to vector<8x32xf32>
    %22 = arith.mulf %17, %21 : vector<8x32xf32>
    %23 = vector.broadcast %2 : vector<1x32xf32> to vector<8x32xf32>
    %24 = arith.mulf %22, %23 : vector<8x32xf32>
    %25 = vector.broadcast %3 : vector<1x32xf32> to vector<8x32xf32>
    %26 = arith.addf %24, %25 : vector<8x32xf32>
    %27 = arith.truncf %26 : vector<8x32xf32> to vector<8x32xbf16>
    %c0_10 = arith.constant 0 : index
    %c0_11 = arith.constant 0 : index
    %28 = vector.load %arg5[%c0_10, %c0_11] : memref<32x96xbf16, #tpu.memory_space<vmem>>, vector<32x96xbf16>
    %cst_12 = arith.constant dense<0.000000e+00> : vector<8x96xf32>
    %29 = tpu.matmul %27, %28, %cst_12 {dimension_numbers = #tpu.dot_dimension_numbers<[1], [0], [0], [1], [0, 0, 1, 1], [], []>} : vector<8x32xbf16>, vector<32x96xbf16>, vector<8x96xf32> -> vector<8x96xf32>
    %c0_13 = arith.constant 0 : index
    %c0_14 = arith.constant 0 : index
    %30 = vector.load %arg6[%c0_13, %c0_14] : memref<1x96xf32, #tpu.memory_space<vmem>>, vector<1x96xf32>
    %31 = vector.broadcast %30 : vector<1x96xf32> to vector<8x96xf32>
    %32 = arith.addf %29, %31 : vector<8x96xf32>
    %33 = vector.extract_strided_slice %32 {offsets = [0, 0], sizes = [8, 32], strides = [1, 1]} : vector<8x96xf32> to vector<8x32xf32>
    %34 = arith.truncf %33 : vector<8x32xf32> to vector<8x32xbf16>
    %c0_15 = arith.constant 0 : index
    %c0_16 = arith.constant 0 : index
    %c0_17 = arith.constant 0 : index
    %35 = vector.load %arg7[%c0_15, %c0_16, %c0_17] : memref<1x8x32xbf16, #tpu.memory_space<vmem>>, vector<1x8x32xbf16>
    %36 = vector.shape_cast %35 : vector<1x8x32xbf16> to vector<8x32xbf16>
    %37 = vector.shape_cast %34 : vector<8x32xbf16> to vector<1x8x32xbf16>
    tpu.vector_store %arg7[%c0_15, %c0_16, %c0_17], %37 {strides = array<i32>} : memref<1x8x32xbf16, #tpu.memory_space<vmem>>, vector<1x8x32xbf16>,
    %38 = vector.extract_strided_slice %32 {offsets = [0, 32], sizes = [8, 32], strides = [1, 1]} : vector<8x96xf32> to vector<8x32xf32>
    %39 = tpu.transpose %38, [1, 0] : vector<8x32xf32> -> vector<32x8xf32>
    %40 = arith.truncf %39 : vector<32x8xf32> to vector<32x8xbf16>
    %c0_18 = arith.constant 0 : index
    %c0_19 = arith.constant 0 : index
    %c0_20 = arith.constant 0 : index
    %41 = vector.load %arg8[%c0_18, %c0_19, %c0_20] : memref<1x32x8xbf16, #tpu.memory_space<vmem>>, vector<1x32x8xbf16>
    %42 = vector.shape_cast %41 : vector<1x32x8xbf16> to vector<32x8xbf16>
    %43 = vector.shape_cast %40 : vector<32x8xbf16> to vector<1x32x8xbf16>
    tpu.vector_store %arg8[%c0_18, %c0_19, %c0_20], %43 {strides = array<i32>} : memref<1x32x8xbf16, #tpu.memory_space<vmem>>, vector<1x32x8xbf16>,
    %44 = vector.extract_strided_slice %32 {offsets = [0, 64], sizes = [8, 32], strides = [1, 1]} : vector<8x96xf32> to vector<8x32xf32>
    %45 = arith.truncf %44 : vector<8x32xf32> to vector<8x32xbf16>
    %c0_21 = arith.constant 0 : index
    %c0_22 = arith.constant 0 : index
    %c0_23 = arith.constant 0 : index
    %46 = vector.load %arg9[%c0_21, %c0_22, %c0_23] : memref<1x8x32xbf16, #tpu.memory_space<vmem>>, vector<1x8x32xbf16>
    %47 = vector.shape_cast %46 : vector<1x8x32xbf16> to vector<8x32xbf16>
    %48 = vector.shape_cast %45 : vector<8x32xbf16> to vector<1x8x32xbf16>
    tpu.vector_store %arg9[%c0_21, %c0_22, %c0_23], %48 {strides = array<i32>} : memref<1x8x32xbf16, #tpu.memory_space<vmem>>, vector<1x8x32xbf16>,
    return
  }
  func.func @transform_0(%arg0: i32, %arg1: i32) -> (i32, i32, i32) {
    %c0_i32 = arith.constant 0 : i32
    %c0_i32_0 = arith.constant 0 : i32
    return %arg0, %arg1, %c0_i32 : i32, i32, i32
  }
  func.func @transform_1(%arg0: i32, %arg1: i32) -> (i32, i32) {
    %c0_i32 = arith.constant 0 : i32
    %c0_i32_0 = arith.constant 0 : i32
    %c0_i32_1 = arith.constant 0 : i32
    return %c0_i32, %c0_i32_0 : i32, i32
  }
  func.func @transform_2(%arg0: i32, %arg1: i32) -> (i32, i32) {
    %c0_i32 = arith.constant 0 : i32
    %c0_i32_0 = arith.constant 0 : i32
    %c0_i32_1 = arith.constant 0 : i32
    return %c0_i32, %c0_i32_0 : i32, i32
  }
  func.func @transform_3(%arg0: i32, %arg1: i32) -> (i32, i32) {
    %c0_i32 = arith.constant 0 : i32
    %c0_i32_0 = arith.constant 0 : i32
    %c0_i32_1 = arith.constant 0 : i32
    return %c0_i32, %c0_i32_0 : i32, i32
  }
  func.func @transform_4(%arg0: i32, %arg1: i32) -> (i32, i32) {
    %c0_i32 = arith.constant 0 : i32
    %c0_i32_0 = arith.constant 0 : i32
    %c0_i32_1 = arith.constant 0 : i32
    return %c0_i32, %c0_i32_0 : i32, i32
  }
  func.func @transform_5(%arg0: i32, %arg1: i32) -> (i32, i32, i32) {
    %c0_i32 = arith.constant 0 : i32
    %c0_i32_0 = arith.constant 0 : i32
    return %arg0, %arg1, %c0_i32 : i32, i32, i32
  }
  func.func @transform_6(%arg0: i32, %arg1: i32) -> (i32, i32, i32) {
    %c0_i32 = arith.constant 0 : i32
    %c0_i32_0 = arith.constant 0 : i32
    return %arg0, %c0_i32, %arg1 : i32, i32, i32
  }
  func.func @transform_7(%arg0: i32, %arg1: i32) -> (i32, i32, i32) {
    %c0_i32 = arith.constant 0 : i32
    %c0_i32_0 = arith.constant 0 : i32
    return %arg0, %arg1, %c0_i32 : i32, i32, i32
  }
}

module attributes {stable_mosaic.version = 11 : i64} {
  func.func @_mlp_kernel(%arg0: i32, %arg1: memref<16x32xbf16, #tpu.memory_space<vmem>>, %arg2: memref<1x32xf32, #tpu.memory_space<vmem>>, %arg3: memref<1x32xf32, #tpu.memory_space<vmem>>, %arg4: memref<32x128xbf16, #tpu.memory_space<vmem>>, %arg5: memref<1x128xf32, #tpu.memory_space<vmem>>, %arg6: memref<128x32xbf16, #tpu.memory_space<vmem>>, %arg7: memref<1x32xf32, #tpu.memory_space<vmem>>, %arg8: memref<16x32xbf16, #tpu.memory_space<vmem>>) attributes {dimension_semantics = [#tpu.dimension_semantics<parallel>], iteration_bounds = array<i64: 1>, scalar_prefetch = 0 : i64, scratch_operands = 0 : i64, tpu.core_type = #tpu.core_type<tc>, window_params = [{transform_indices = @transform_0, window_bounds = array<i64: 16, 32>}, {pipeline_mode = #tpu.pipeline_mode<synchronous>, transform_indices = @transform_1, window_bounds = array<i64: 1, 32>}, {pipeline_mode = #tpu.pipeline_mode<synchronous>, transform_indices = @transform_2, window_bounds = array<i64: 1, 32>}, {pipeline_mode = #tpu.pipeline_mode<synchronous>, transform_indices = @transform_3, window_bounds = array<i64: 32, 128>}, {pipeline_mode = #tpu.pipeline_mode<synchronous>, transform_indices = @transform_4, window_bounds = array<i64: 1, 128>}, {pipeline_mode = #tpu.pipeline_mode<synchronous>, transform_indices = @transform_5, window_bounds = array<i64: 128, 32>}, {pipeline_mode = #tpu.pipeline_mode<synchronous>, transform_indices = @transform_6, window_bounds = array<i64: 1, 32>}, {transform_indices = @transform_7, window_bounds = array<i64: 16, 32>}]} {
    %c0 = arith.constant 0 : index
    %c0_0 = arith.constant 0 : index
    %0 = vector.load %arg1[%c0, %c0_0] : memref<16x32xbf16, #tpu.memory_space<vmem>>, vector<16x32xbf16>
    %c0_1 = arith.constant 0 : index
    %c0_2 = arith.constant 0 : index
    %1 = vector.load %arg2[%c0_1, %c0_2] : memref<1x32xf32, #tpu.memory_space<vmem>>, vector<1x32xf32>
    %c0_3 = arith.constant 0 : index
    %c0_4 = arith.constant 0 : index
    %2 = vector.load %arg3[%c0_3, %c0_4] : memref<1x32xf32, #tpu.memory_space<vmem>>, vector<1x32xf32>
    %3 = arith.extf %0 : vector<16x32xbf16> to vector<16x32xf32>
    %cst = arith.constant dense<0.000000e+00> : vector<16xf32>
    %4 = vector.multi_reduction <add>, %3, %cst [1] : vector<16x32xf32> to vector<16xf32>
    %5 = vector.shape_cast %4 : vector<16xf32> to vector<16x1xf32>
    %cst_5 = arith.constant 3.200000e+01 : f32
    %6 = vector.broadcast %cst_5 : f32 to vector<16x1xf32>
    %7 = arith.divf %5, %6 : vector<16x1xf32>
    %8 = vector.broadcast %7 : vector<16x1xf32> to vector<16x32xf32>
    %9 = arith.subf %3, %8 : vector<16x32xf32>
    %10 = arith.mulf %9, %9 : vector<16x32xf32>
    %cst_6 = arith.constant dense<0.000000e+00> : vector<16xf32>
    %11 = vector.multi_reduction <add>, %10, %cst_6 [1] : vector<16x32xf32> to vector<16xf32>
    %12 = vector.shape_cast %11 : vector<16xf32> to vector<16x1xf32>
    %cst_7 = arith.constant 3.200000e+01 : f32
    %13 = vector.broadcast %cst_7 : f32 to vector<16x1xf32>
    %14 = arith.divf %12, %13 : vector<16x1xf32>
    %15 = vector.broadcast %7 : vector<16x1xf32> to vector<16x32xf32>
    %16 = arith.subf %3, %15 : vector<16x32xf32>
    %cst_8 = arith.constant 9.99999997E-7 : f32
    %17 = vector.broadcast %cst_8 : f32 to vector<16x1xf32>
    %18 = arith.addf %14, %17 : vector<16x1xf32>
    %19 = math.rsqrt %18 : vector<16x1xf32>
    %20 = vector.broadcast %19 : vector<16x1xf32> to vector<16x32xf32>
    %21 = arith.mulf %16, %20 : vector<16x32xf32>
    %22 = vector.broadcast %1 : vector<1x32xf32> to vector<16x32xf32>
    %23 = arith.mulf %21, %22 : vector<16x32xf32>
    %24 = vector.broadcast %2 : vector<1x32xf32> to vector<16x32xf32>
    %25 = arith.addf %23, %24 : vector<16x32xf32>
    %26 = arith.truncf %25 : vector<16x32xf32> to vector<16x32xbf16>
    %c0_9 = arith.constant 0 : index
    %c0_10 = arith.constant 0 : index
    %27 = vector.load %arg4[%c0_9, %c0_10] : memref<32x128xbf16, #tpu.memory_space<vmem>>, vector<32x128xbf16>
    %cst_11 = arith.constant dense<0.000000e+00> : vector<16x128xf32>
    %28 = tpu.matmul %26, %27, %cst_11 {dimension_numbers = #tpu.dot_dimension_numbers<[1], [0], [0], [1], [0, 0, 1, 1], [], []>} : vector<16x32xbf16>, vector<32x128xbf16>, vector<16x128xf32> -> vector<16x128xf32>
    %c0_12 = arith.constant 0 : index
    %c0_13 = arith.constant 0 : index
    %29 = vector.load %arg5[%c0_12, %c0_13] : memref<1x128xf32, #tpu.memory_space<vmem>>, vector<1x128xf32>
    %30 = vector.broadcast %29 : vector<1x128xf32> to vector<16x128xf32>
    %31 = arith.addf %28, %30 : vector<16x128xf32>
    %32 = arith.mulf %31, %31 : vector<16x128xf32>
    %33 = arith.mulf %31, %32 : vector<16x128xf32>
    %cst_14 = arith.constant 4.471500e-02 : f32
    %34 = vector.broadcast %cst_14 : f32 to vector<16x128xf32>
    %35 = arith.mulf %34, %33 : vector<16x128xf32>
    %36 = arith.addf %31, %35 : vector<16x128xf32>
    %cst_15 = arith.constant 0.797884583 : f32
    %37 = vector.broadcast %cst_15 : f32 to vector<16x128xf32>
    %38 = arith.mulf %37, %36 : vector<16x128xf32>
    %39 = math.tanh %38 : vector<16x128xf32>
    %cst_16 = arith.constant 1.000000e+00 : f32
    %40 = vector.broadcast %cst_16 : f32 to vector<16x128xf32>
    %41 = arith.addf %40, %39 : vector<16x128xf32>
    %cst_17 = arith.constant 5.000000e-01 : f32
    %42 = vector.broadcast %cst_17 : f32 to vector<16x128xf32>
    %43 = arith.mulf %42, %41 : vector<16x128xf32>
    %44 = arith.mulf %31, %43 : vector<16x128xf32>
    %45 = arith.truncf %44 : vector<16x128xf32> to vector<16x128xbf16>
    %c0_18 = arith.constant 0 : index
    %c0_19 = arith.constant 0 : index
    %46 = vector.load %arg6[%c0_18, %c0_19] : memref<128x32xbf16, #tpu.memory_space<vmem>>, vector<128x32xbf16>
    %cst_20 = arith.constant dense<0.000000e+00> : vector<16x32xf32>
    %47 = tpu.matmul %45, %46, %cst_20 {dimension_numbers = #tpu.dot_dimension_numbers<[1], [0], [0], [1], [0, 0, 1, 1], [], []>} : vector<16x128xbf16>, vector<128x32xbf16>, vector<16x32xf32> -> vector<16x32xf32>
    %c0_21 = arith.constant 0 : index
    %c0_22 = arith.constant 0 : index
    %48 = vector.load %arg7[%c0_21, %c0_22] : memref<1x32xf32, #tpu.memory_space<vmem>>, vector<1x32xf32>
    %49 = vector.broadcast %48 : vector<1x32xf32> to vector<16x32xf32>
    %50 = arith.addf %47, %49 : vector<16x32xf32>
    %51 = arith.extf %0 : vector<16x32xbf16> to vector<16x32xf32>
    %52 = arith.addf %51, %50 : vector<16x32xf32>
    %53 = arith.truncf %52 : vector<16x32xf32> to vector<16x32xbf16>
    %c0_23 = arith.constant 0 : index
    %c0_24 = arith.constant 0 : index
    %54 = vector.load %arg8[%c0_23, %c0_24] : memref<16x32xbf16, #tpu.memory_space<vmem>>, vector<16x32xbf16>
    tpu.vector_store %arg8[%c0_23, %c0_24], %53 {strides = array<i32>} : memref<16x32xbf16, #tpu.memory_space<vmem>>, vector<16x32xbf16>,
    return
  }
  func.func @transform_0(%arg0: i32) -> (i32, i32) {
    %c0_i32 = arith.constant 0 : i32
    %c0_i32_0 = arith.constant 0 : i32
    return %arg0, %c0_i32 : i32, i32
  }
  func.func @transform_1(%arg0: i32) -> (i32, i32) {
    %c0_i32 = arith.constant 0 : i32
    %c0_i32_0 = arith.constant 0 : i32
    %c0_i32_1 = arith.constant 0 : i32
    return %c0_i32, %c0_i32_0 : i32, i32
  }
  func.func @transform_2(%arg0: i32) -> (i32, i32) {
    %c0_i32 = arith.constant 0 : i32
    %c0_i32_0 = arith.constant 0 : i32
    %c0_i32_1 = arith.constant 0 : i32
    return %c0_i32, %c0_i32_0 : i32, i32
  }
  func.func @transform_3(%arg0: i32) -> (i32, i32) {
    %c0_i32 = arith.constant 0 : i32
    %c0_i32_0 = arith.constant 0 : i32
    %c0_i32_1 = arith.constant 0 : i32
    return %c0_i32, %c0_i32_0 : i32, i32
  }
  func.func @transform_4(%arg0: i32) -> (i32, i32) {
    %c0_i32 = arith.constant 0 : i32
    %c0_i32_0 = arith.constant 0 : i32
    %c0_i32_1 = arith.constant 0 : i32
    return %c0_i32, %c0_i32_0 : i32, i32
  }
  func.func @transform_5(%arg0: i32) -> (i32, i32) {
    %c0_i32 = arith.constant 0 : i32
    %c0_i32_0 = arith.constant 0 : i32
    %c0_i32_1 = arith.constant 0 : i32
    return %c0_i32, %c0_i32_0 : i32, i32
  }
  func.func @transform_6(%arg0: i32) -> (i32, i32) {
    %c0_i32 = arith.constant 0 : i32
    %c0_i32_0 = arith.constant 0 : i32
    %c0_i32_1 = arith.constant 0 : i32
    return %c0_i32, %c0_i32_0 : i32, i32
  }
  func.func @transform_7(%arg0: i32) -> (i32, i32) {
    %c0_i32 = arith.constant 0 : i32
    %c0_i32_0 = arith.constant 0 : i32
    return %arg0, %c0_i32 : i32, i32
  }
}

module attributes {stable_mosaic.version = 11 : i64} {
  func.func @_ln_head_kernel(%arg0: i32, %arg1: memref<8x32xbf16, #tpu.memory_space<vmem>>, %arg2: memref<1x32xf32, #tpu.memory_space<vmem>>, %arg3: memref<1x32xf32, #tpu.memory_space<vmem>>, %arg4: memref<32x128xbf16, #tpu.memory_space<vmem>>, %arg5: memref<1x128xf32, #tpu.memory_space<vmem>>, %arg6: memref<8x128xf32, #tpu.memory_space<vmem>>) attributes {dimension_semantics = [#tpu.dimension_semantics<arbitrary>], iteration_bounds = array<i64: 1>, scalar_prefetch = 0 : i64, scratch_operands = 0 : i64, tpu.core_type = #tpu.core_type<tc>, window_params = [{pipeline_mode = #tpu.pipeline_mode<synchronous>, transform_indices = @transform_0, window_bounds = array<i64: 8, 32>}, {pipeline_mode = #tpu.pipeline_mode<synchronous>, transform_indices = @transform_1, window_bounds = array<i64: 1, 32>}, {pipeline_mode = #tpu.pipeline_mode<synchronous>, transform_indices = @transform_2, window_bounds = array<i64: 1, 32>}, {pipeline_mode = #tpu.pipeline_mode<synchronous>, transform_indices = @transform_3, window_bounds = array<i64: 32, 128>}, {pipeline_mode = #tpu.pipeline_mode<synchronous>, transform_indices = @transform_4, window_bounds = array<i64: 1, 128>}, {pipeline_mode = #tpu.pipeline_mode<synchronous>, transform_indices = @transform_5, window_bounds = array<i64: 8, 128>}]} {
    %c0 = arith.constant 0 : index
    %c0_0 = arith.constant 0 : index
    %0 = vector.load %arg1[%c0, %c0_0] : memref<8x32xbf16, #tpu.memory_space<vmem>>, vector<8x32xbf16>
    %c0_1 = arith.constant 0 : index
    %c0_2 = arith.constant 0 : index
    %1 = vector.load %arg2[%c0_1, %c0_2] : memref<1x32xf32, #tpu.memory_space<vmem>>, vector<1x32xf32>
    %c0_3 = arith.constant 0 : index
    %c0_4 = arith.constant 0 : index
    %2 = vector.load %arg3[%c0_3, %c0_4] : memref<1x32xf32, #tpu.memory_space<vmem>>, vector<1x32xf32>
    %3 = arith.extf %0 : vector<8x32xbf16> to vector<8x32xf32>
    %cst = arith.constant dense<0.000000e+00> : vector<8xf32>
    %4 = vector.multi_reduction <add>, %3, %cst [1] : vector<8x32xf32> to vector<8xf32>
    %5 = vector.shape_cast %4 : vector<8xf32> to vector<8x1xf32>
    %cst_5 = arith.constant 3.200000e+01 : f32
    %6 = vector.broadcast %cst_5 : f32 to vector<8x1xf32>
    %7 = arith.divf %5, %6 : vector<8x1xf32>
    %8 = vector.broadcast %7 : vector<8x1xf32> to vector<8x32xf32>
    %9 = arith.subf %3, %8 : vector<8x32xf32>
    %10 = arith.mulf %9, %9 : vector<8x32xf32>
    %cst_6 = arith.constant dense<0.000000e+00> : vector<8xf32>
    %11 = vector.multi_reduction <add>, %10, %cst_6 [1] : vector<8x32xf32> to vector<8xf32>
    %12 = vector.shape_cast %11 : vector<8xf32> to vector<8x1xf32>
    %cst_7 = arith.constant 3.200000e+01 : f32
    %13 = vector.broadcast %cst_7 : f32 to vector<8x1xf32>
    %14 = arith.divf %12, %13 : vector<8x1xf32>
    %15 = vector.broadcast %7 : vector<8x1xf32> to vector<8x32xf32>
    %16 = arith.subf %3, %15 : vector<8x32xf32>
    %cst_8 = arith.constant 9.99999997E-7 : f32
    %17 = vector.broadcast %cst_8 : f32 to vector<8x1xf32>
    %18 = arith.addf %14, %17 : vector<8x1xf32>
    %19 = math.rsqrt %18 : vector<8x1xf32>
    %20 = vector.broadcast %19 : vector<8x1xf32> to vector<8x32xf32>
    %21 = arith.mulf %16, %20 : vector<8x32xf32>
    %22 = vector.broadcast %1 : vector<1x32xf32> to vector<8x32xf32>
    %23 = arith.mulf %21, %22 : vector<8x32xf32>
    %24 = vector.broadcast %2 : vector<1x32xf32> to vector<8x32xf32>
    %25 = arith.addf %23, %24 : vector<8x32xf32>
    %26 = arith.truncf %25 : vector<8x32xf32> to vector<8x32xbf16>
    %c0_9 = arith.constant 0 : index
    %c0_10 = arith.constant 0 : index
    %27 = vector.load %arg4[%c0_9, %c0_10] : memref<32x128xbf16, #tpu.memory_space<vmem>>, vector<32x128xbf16>
    %cst_11 = arith.constant dense<0.000000e+00> : vector<8x128xf32>
    %28 = tpu.matmul %26, %27, %cst_11 {dimension_numbers = #tpu.dot_dimension_numbers<[1], [0], [0], [1], [0, 0, 1, 1], [], []>} : vector<8x32xbf16>, vector<32x128xbf16>, vector<8x128xf32> -> vector<8x128xf32>
    %c0_12 = arith.constant 0 : index
    %c0_13 = arith.constant 0 : index
    %29 = vector.load %arg5[%c0_12, %c0_13] : memref<1x128xf32, #tpu.memory_space<vmem>>, vector<1x128xf32>
    %30 = vector.broadcast %29 : vector<1x128xf32> to vector<8x128xf32>
    %31 = arith.addf %28, %30 : vector<8x128xf32>
    %c0_14 = arith.constant 0 : index
    %c0_15 = arith.constant 0 : index
    %32 = vector.load %arg6[%c0_14, %c0_15] : memref<8x128xf32, #tpu.memory_space<vmem>>, vector<8x128xf32>
    tpu.vector_store %arg6[%c0_14, %c0_15], %31 {strides = array<i32>} : memref<8x128xf32, #tpu.memory_space<vmem>>, vector<8x128xf32>,
    return
  }
  func.func @transform_0(%arg0: i32) -> (i32, i32) {
    %c0_i32 = arith.constant 0 : i32
    %c0_i32_0 = arith.constant 0 : i32
    %c0_i32_1 = arith.constant 0 : i32
    return %c0_i32, %c0_i32_0 : i32, i32
  }
  func.func @transform_1(%arg0: i32) -> (i32, i32) {
    %c0_i32 = arith.constant 0 : i32
    %c0_i32_0 = arith.constant 0 : i32
    %c0_i32_1 = arith.constant 0 : i32
    return %c0_i32, %c0_i32_0 : i32, i32
  }
  func.func @transform_2(%arg0: i32) -> (i32, i32) {
    %c0_i32 = arith.constant 0 : i32
    %c0_i32_0 = arith.constant 0 : i32
    %c0_i32_1 = arith.constant 0 : i32
    return %c0_i32, %c0_i32_0 : i32, i32
  }
  func.func @transform_3(%arg0: i32) -> (i32, i32) {
    %c0_i32 = arith.constant 0 : i32
    %c0_i32_0 = arith.constant 0 : i32
    %c0_i32_1 = arith.constant 0 : i32
    return %c0_i32, %c0_i32_0 : i32, i32
  }
  func.func @transform_4(%arg0: i32) -> (i32, i32) {
    %c0_i32 = arith.constant 0 : i32
    %c0_i32_0 = arith.constant 0 : i32
    %c0_i32_1 = arith.constant 0 : i32
    return %c0_i32, %c0_i32_0 : i32, i32
  }
  func.func @transform_5(%arg0: i32) -> (i32, i32) {
    %c0_i32 = arith.constant 0 : i32
    %c0_i32_0 = arith.constant 0 : i32
    %c0_i32_1 = arith.constant 0 : i32
    return %c0_i32, %c0_i32_0 : i32, i32
  }
}

</mosaic_0001>

<bundles_post_ra>
// kernel: vit_forward.9
= control target key start
LH: loop header
LB: loop body
LE: loop exit
PB: predicated region body
PF: predicated region fallthrough
CT: control target
= control target key end

     0   :  { %s814_s24 = smov 0   ;;  %s816_s25 = smov 0   ;;  %s880_s0 = inlined_call_operand.vmem [shape: bf16[2,8,32], index: 0, kind: input, shape index: {}]   ;;  %s881_s1 = inlined_call_operand.vmem [shape: f32[1,32], index: 1, kind: input, shape index: {}]   ;;  %s882_s2 = inlined_call_operand.vmem [shape: f32[1,32], index: 2, kind: input, shape index: {}]   ;;  %s883_s3 = inlined_call_operand.vmem [shape: bf16[32,96], index: 3, kind: input, shape index: {}]   ;;  %s884_s4 = inlined_call_operand.vmem [shape: f32[1,96], index: 4, kind: input, shape index: {}]   ;;  %s885_s5 = inlined_call_operand.vmem [shape: bf16[2,8,32], index: 5, kind: output, shape index: {0}]   ;;  %s886_s6 = inlined_call_operand.vmem [shape: bf16[2,32,8], index: 6, kind: output, shape index: {1}]   ;;  %s887_s7 = inlined_call_operand.vmem [shape: bf16[2,8,32], index: 7, kind: output, shape index: {2}]  }
   0x1   :  { %s818_s26 = smov 0  }
   0x2 LB: > { %s30_s27 = sadd.s32 1, %s764_s25  ;;  %p678_p0 = scmp.ge.s32.totalorder %s768_s26, 1  ;;  %s768_s26 = sphi %s818_s26, %s18_s26   ;;  %s764_s25 = sphi %s816_s25, %s889_s25   ;;  %s760_s24 = sphi %s814_s24, %s888_s24  }
   0x3   : > { %p32_p1 = scmp.ge.s32.totalorder %s30_s27, 2  ;;  %p264_p2 = scmp.lt.s32.totalorder %s768_s26, 3 }
   0x5   : > { %s891_s27 = smov (%p32_p1, %s30_s27), 0  ;;  %p265_p3 = pnand %p678_p0, %p264_p2 }
   0x6   : > { %p315_p4 = scmp.lt.s32.totalorder (!%p265_p3), %s760_s24, 1  ;;  %s772_s22 = smov (!%p265_p3), 96  }
   0x7   : > { %268 = sbr.rel (%p265_p3) target bundleno = 778 (0x30a), region = 40  ;;  %s773_s23 = smov (!%p265_p3), 64  }
   0xc   : > { %s893_s24 = smov (!%p315_p4, %s760_s24), 1  ;;  %vm349_vm0 = vcmask 261120   ;;  %v742_v8 = vld [vmem:[%s883_s3 + $0x8] sm:$0xff]   ;;  %v770_v9 = vmov 0.0   ;;  %vm771_vm1 = vmmov 0   ;;  %v743_v10 = vld [vmem:[%s883_s3] sm:$0xff]  }
   0xd   : > { %s835_s28 = sshll.u32 %s893_s24, 2  ;;  %706 = vmatprep.subr.bf16.mxu0 %v770_v9  ;;  %710 = vmatprep.mubr.msk.bf16.mxu0 %vm771_vm1, %v770_v9  ;;  %v684_v15 = vld [vmem:[%s881_s1] ss:$0 sm:$0xff]  ;;  %vm446_vm2 = vcmask 257024   ;;  %s697_s9 = sshll.u32 %s893_s24, 4  ;;  %vm500_vm3 = vcmask 60416  }
   0xe   : > { %s321_s8 = scalar_lea.vmem %s880_s0, %s835_s28  ;;  %707 = vmatpush3.bf16.msra.mxu0 %v742_v8  ;;  %v685_v17 = vld [vmem:[%s882_s2] ss:$0 sm:$0xff]  ;;  %s328_s21 = scalar_lea.vmem %s885_s5, %s835_s28 }
   0xf   : > { %v345_v0 = vld [vmem:[%s321_s8] sm:$0xf]  ;;  %708 = vmatprep.subr.bf16.mxu0 %v770_v9  ;;  %s343_s8 = scalar_lea.vmem %s887_s7, %s835_s28  ;;  %s336_s12 = scalar_lea.vmem %s886_s6, %s697_s9 }
  0x10   : > { %v348_v1 = vunpack.c.l.bf16 %v345_v0  ;;  %v686_v21 = vld [vmem:[%s884_s4] ss:$0 sm:$0xff] }
  0x12   : > { %v350_v2 = vsel %vm349_vm0, %v348_v1, 0.0  ;;  %709 = vmatpush3.bf16.msra.mxu0 %v743_v10 }
  0x13   : > { %351 = vadd.xlane.f32.xlu0 %v350_v2 }
  0x9c   : > { %v352_v3 = vpop.xlane.xlu0 %351 }
  0x9d   : > { %v354_v4 = vmul.f32 0.03125, %v352_v3 }
  0x9f   : > { %v355_v5 = vsub.f32 %v348_v1, %v354_v4 }
  0xa1   : > { %v356_v6 = vmul.f32 %v355_v5, %v355_v5 }
  0xa3   : > { %v357_v7 = vsel %vm349_vm0, %v356_v6, 0.0 }
  0xa4   : > { %358 = vadd.xlane.f32.xlu0 %v357_v7 }
 0x12d   : > { %v359_v11 = vpop.xlane.xlu0 %358 }
 0x12e   : > { %v360_v12 = vmul.f32 0.03125, %v359_v11 }
 0x130   : > { %v361_v13 = vadd.f32 1e-06, %v360_v12 }
 0x132   : > { %744 = vrsqrt.f32 %v361_v13 }
 0x13f   : > { %v745_v14 = vpop.eup %744 }
 0x140   : > { %v363_v16 = vmul.f32 %v745_v14, %v355_v5 }
 0x142   : > { %v370_v18 = vmul.f32 %v684_v15, %v363_v16 }
 0x144   : > { %v377_v19 = vadd.f32 %v685_v17, %v370_v18 }
 0x146   : > { %v378_v20 = vpack.c.bf16 %v377_v19, %v377_v19 }
 0x148   : > { %711 = vmatmul.mubr.msk.bf16.vlgmr.msra.gmra.mxu0 %vm349_vm0, %v378_v20 }
 0x208   : > { %v439_v22 = vpop.f32.mrf.mxu0 }
 0x209   : > { %v440_v23 = vadd.f32 %v686_v21, %v439_v22 }
 0x20a   : > { %v712_v24 = vpop.f32.mrf.mxu0 }
 0x20b   : > { %v445_v25 = vpack.c.bf16 %v440_v23, %v440_v23  ;;  %449 = vrot.lane.b32.xlu1 %v440_v23, %s772_s22 }
 0x20c   : > { %v442_v26 = vpop.f32.mrf.mxu0 }
 0x20d   : > { %447 = vst.msk [vmem:[%s328_s21] sm:$0xf] %vm446_vm2, %v445_v25 }
 0x20e   : > { %v713_v27 = vpop.f32.mrf.mxu0 }
 0x20f   : > { %508 = vrot.lane.b32.xlu1 %v445_v25, %s773_s23 }
 0x27d   : > { %v450_v28 = vpop.permute.xlu1 %449 }
 0x27e   : > { %452 = vxpose.xlu0.b32.start.end [1/1] (short) (narrow) %v450_v28, 32 }
 0x281   : > { %v509_v29 = vpop.permute.xlu1 %508 }
 0x282   : > { %511 = vst.msk [vmem:[%s343_s8] sm:$0xf] %vm446_vm2, %v509_v29 }
 0x2fa   : > { %v468_v30 = vpop.trf.xlu0 }
 0x2fb   : > { %v698_v31 = vpack.c.bf16 %v468_v30, %v468_v30 }
 0x2fd   : > { %501 = vst.msk [vmem:[%s336_s12] sm:$0xf] %vm500_vm3, %v698_v31 }
 0x2fe   : > { %v469_v32 = vpop.trf.xlu0 }
 0x2ff   : > { %v699_v33 = vpack.c.bf16 %v469_v32, %v469_v32 }
 0x301   : > { %502 = vst.msk [vmem:[%s336_s12 + $0x4] sm:$0xf] %vm500_vm3, %v699_v33 }
 0x302   : > { %v470_v34 = vpop.trf.xlu0 }
 0x303   : > { %v700_v35 = vpack.c.bf16 %v470_v34, %v470_v34 }
 0x305   : > { %503 = vst.msk [vmem:[%s336_s12 + $0x8] sm:$0xf] %vm500_vm3, %v700_v35 }
 0x306   : > { %v471_v36 = vpop.trf.xlu0 }
 0x307   : > { %v701_v37 = vpack.c.bf16 %v471_v36, %v471_v36 }
 0x309   : > { %504 = vst.msk [vmem:[%s336_s12 + $0xc] sm:$0xf] %vm500_vm3, %v701_v37 }
 0x30a PF: > { %s18_s26 = sadd.s32 1, %s768_s26   ;;  %s888_s24 = smov %s764_s25 }
 0x30b   : > { %p15_p5 = scmp.ge.s32.totalorder %s18_s26, 4   ;;  %s889_s25 = smov %s891_s27 }
 0x30d   :  { %17 = sbr.rel (!%p15_p5) target bundleno = 2 (0x2), region = 94 }

// kernel: vit_forward.8
= control target key start
LH: loop header
LB: loop body
LE: loop exit
PB: predicated region body
PF: predicated region fallthrough
CT: control target
= control target key end

     0   :  { %v207_v0 = vmov 0   ;;  %vm125_vm0 = vcmask 523264   ;;  %vm170_vm1 = vcmask 257024   ;;  %s273_s1 = inlined_call_operand.vmem [shape: bf16[192,32], index: 1, kind: input, shape index: {}]   ;;  %s274_s0 = inlined_call_operand.vmem [shape: bf16[8,192], index: 0, kind: input, shape index: {}]   ;;  %s275_s2 = inlined_call_operand.vmem [shape: f32[1,32], index: 2, kind: input, shape index: {}]   ;;  %s276_s3 = inlined_call_operand.vmem [shape: bf16[8,32], index: 3, kind: output, shape index: {}]  }
   0x1   :  { %129 = vmatprep.subr.bf16.mxu0 %v207_v0  ;;  %v193_v1 = vld [vmem:[%s273_s1 + $0x38] sm:$0xff]   ;;  %v194_v2 = vld [vmem:[%s273_s1 + $0x30] sm:$0xff]   ;;  %v195_v3 = vld [vmem:[%s273_s1 + $0x28] sm:$0xff]  }
   0x2   :  { %130 = vmatpush1.bf16.msra.mxu0 %v193_v1  ;;  %v196_v4 = vld [vmem:[%s273_s1 + $0x20] sm:$0xff]   ;;  %v197_v7 = vld [vmem:[%s273_s1 + $0x18] sm:$0xff]   ;;  %v198_v8 = vld [vmem:[%s273_s1 + $0x10] sm:$0xff]  }
   0x3   :  { %131 = vmatprep.subr.bf16.mxu0 %v207_v0  ;;  %v15_v5 = vld [vmem:[%s274_s0] sm:$0xff]  ;;  %v199_v9 = vld [vmem:[%s273_s1 + $0x8] sm:$0xff]   ;;  %v201_v11 = vld [vmem:[%s273_s1 + $0x58] sm:$0xff]  }
   0x4   :  { %v178_v6 = vcombine.high %v15_v5, %v15_v5  ;;  %v200_v10 = vld [vmem:[%s273_s1] sm:$0xff]   ;;  %v202_v12 = vld [vmem:[%s273_s1 + $0x50] sm:$0xff]   ;;  %v203_v13 = vld [vmem:[%s273_s1 + $0x48] sm:$0xff]   ;;  %v177_v15 = vcombine.low %v15_v5, %v15_v5 }
   0x5   :  { %v204_v14 = vld [vmem:[%s273_s1 + $0x40] sm:$0xff]  }
   0x6   :  { %132 = vmatpush1.bf16.msra.mxu0 %v194_v2  ;;  %191 = vmatprep.mubr.msk.bf16.mxu0 %vm125_vm0, %v178_v6  ;;  %v176_v16 = vld [vmem:[%s275_s2] ss:$0 sm:$0xff] }
   0x7   :  { %133 = vmatprep.subr.bf16.mxu0 %v207_v0 }
   0xa   :  { %134 = vmatpush1.bf16.msra.mxu0 %v195_v3 }
   0xb   :  { %135 = vmatprep.subr.bf16.mxu0 %v207_v0 }
   0xe   :  { %136 = vmatpush1.bf16.msra.mxu0 %v196_v4 }
   0xf   :  { %137 = vmatprep.subr.bf16.mxu0 %v207_v0 }
  0x12   :  { %138 = vmatpush1.bf16.msra.mxu0 %v197_v7 }
  0x13   :  { %139 = vmatprep.subr.bf16.mxu0 %v207_v0 }
  0x16   :  { %140 = vmatpush1.bf16.msra.mxu0 %v198_v8 }
  0x17   :  { %141 = vmatprep.subr.bf16.mxu0 %v207_v0 }
  0x1a   :  { %142 = vmatpush1.bf16.msra.mxu0 %v199_v9 }
  0x1b   :  { %143 = vmatprep.subr.bf16.mxu0 %v207_v0 }
  0x1e   :  { %144 = vmatpush1.bf16.msra.mxu0 %v200_v10 }
  0x1f   :  { %153 = vmatprep.subr.bf16.mxu0 %v207_v0 }
  0x22   :  { %154 = vmatpush2.bf16.msra.mxu0 %v201_v11 }
  0x23   :  { %155 = vmatprep.subr.bf16.mxu0 %v207_v0 }
  0x26   :  { %156 = vmatpush2.bf16.msra.mxu0 %v202_v12 }
  0x27   :  { %157 = vmatprep.subr.bf16.mxu0 %v207_v0 }
  0x2a   :  { %158 = vmatpush2.bf16.msra.mxu0 %v203_v13 }
  0x2b   :  { %159 = vmatprep.subr.bf16.mxu0 %v207_v0 }
  0x2e   :  { %160 = vmatpush2.bf16.msra.mxu0 %v204_v14 }
  0x31   :  { %162 = vmatmul.mubr.bf16.vlgmr.msra.gmra.mxu0 %v177_v15 }
  0xf1   :  { %v163_v17 = vpop.f32.mrf.mxu0 }
  0xf2   :  { %v164_v18 = vadd.f32 %v176_v16, %v163_v17 }
  0xf3   :  { %v165_v19 = vpop.f32.mrf.mxu0 }
  0xf4   :  { %v169_v20 = vpack.c.bf16 %v164_v18, %v164_v18 }
  0xf5   :  { %v166_v21 = vpop.f32.mrf.mxu0 }
  0xf6   :  { %171 = vst.msk [vmem:[%s276_s3] sm:$0xf] %vm170_vm1, %v169_v20 }
  0xf7   :  { %v167_v22 = vpop.f32.mrf.mxu0 }

// kernel: vit_forward.11
= control target key start
LH: loop header
LB: loop body
LE: loop exit
PB: predicated region body
PF: predicated region fallthrough
CT: control target
= control target key end

     0   :  { %vm33_vm0 = vcmask 261120   ;;  %v376_v15 = vmov 0.0   ;;  %vm377_vm1 = vmmov 0   ;;  %vm286_vm2 = vcmask 257024   ;;  %s484_s0 = inlined_call_operand.vmem [shape: bf16[16,32], index: 0, kind: input, shape index: {}]   ;;  %s485_s3 = inlined_call_operand.vmem [shape: bf16[32,128], index: 3, kind: input, shape index: {}]   ;;  %s486_s1 = inlined_call_operand.vmem [shape: f32[1,32], index: 1, kind: input, shape index: {}]   ;;  %s487_s2 = inlined_call_operand.vmem [shape: f32[1,32], index: 2, kind: input, shape index: {}]   ;;  %s488_s5 = inlined_call_operand.vmem [shape: bf16[128,32], index: 5, kind: input, shape index: {}]   ;;  %s489_s4 = inlined_call_operand.vmem [shape: f32[1,128], index: 4, kind: input, shape index: {}]   ;;  %s490_s6 = inlined_call_operand.vmem [shape: f32[1,32], index: 6, kind: input, shape index: {}]   ;;  %s491_s7 = inlined_call_operand.vmem [shape: bf16[16,32], index: 7, kind: output, shape index: {}]  }
   0x1   :  { %v313_v0 = vld [vmem:[%s484_s0] sm:$0xff]   ;;  %328 = vmatprep.subr.bf16.mxu0 %v376_v15  ;;  %v358_v16 = vld [vmem:[%s485_s3 + $0x8] sm:$0xff]   ;;  %332 = vmatprep.mubr.msk.bf16.mxu0 %vm377_vm1, %v376_v15  ;;  %v360_v35 = vld [vmem:[%s488_s5 + $0x38] sm:$0xff]  }
   0x2   :  { %v421_v1 = vunpack.c.l.bf16 %v313_v0  ;;  %v423_v2 = vunpack.c.h.bf16 %v313_v0  ;;  %336 = vmatprep.subr.bf16.mxu1 %v376_v15  ;;  %352 = vmatprep.mubr.msk.bf16.mxu1 %vm377_vm1, %v376_v15  ;;  %v359_v17 = vld [vmem:[%s485_s3] sm:$0xff]   ;;  %v361_v36 = vld [vmem:[%s488_s5 + $0x30] sm:$0xff]   ;;  %v362_v37 = vld [vmem:[%s488_s5 + $0x28] sm:$0xff]  }
   0x3   :  { %329 = vmatpush3.bf16.msra.mxu0 %v358_v16  ;;  %v293_v26 = vld [vmem:[%s486_s1] ss:$0 sm:$0xff]  ;;  %337 = vmatpush3.bf16.msra.mxu1 %v360_v35  ;;  %v364_v39 = vld [vmem:[%s488_s5 + $0x18] sm:$0xff]   ;;  %v365_v40 = vld [vmem:[%s488_s5 + $0x10] sm:$0xff]  }
   0x4   :  { %v34_v3 = vsel %vm33_vm0, %v421_v1, 0.0  ;;  %v37_v4 = vsel %vm33_vm0, %v423_v2, 0.0  ;;  %330 = vmatprep.subr.bf16.mxu0 %v376_v15  ;;  %v294_v30 = vld [vmem:[%s487_s2] ss:$0 sm:$0xff]  ;;  %338 = vmatprep.subr.bf16.mxu1 %v376_v15  ;;  %v366_v41 = vld [vmem:[%s488_s5 + $0x8] sm:$0xff]  }
   0x5   :  { %35 = vadd.xlane.f32.xlu0 %v34_v3  ;;  %v363_v38 = vld [vmem:[%s488_s5 + $0x20] sm:$0xff]  }
   0x6   :  { %v367_v42 = vld [vmem:[%s488_s5] sm:$0xff]  }
   0x7   :  { %331 = vmatpush3.bf16.msra.mxu0 %v359_v17  ;;  %339 = vmatpush3.bf16.msra.mxu1 %v361_v36  ;;  %v295_v43 = vld [vmem:[%s489_s4] ss:$0 sm:$0xff] }
   0x8   :  { %340 = vmatprep.subr.bf16.mxu1 %v376_v15 }
   0x9   :  { %38 = vadd.xlane.f32.xlu0 %v37_v4 }
   0xb   :  { %341 = vmatpush3.bf16.msra.mxu1 %v362_v37 }
   0xc   :  { %342 = vmatprep.subr.bf16.mxu1 %v376_v15 }
   0xf   :  { %343 = vmatpush3.bf16.msra.mxu1 %v363_v38 }
  0x10   :  { %344 = vmatprep.subr.bf16.mxu1 %v376_v15 }
  0x13   :  { %345 = vmatpush3.bf16.msra.mxu1 %v364_v39 }
  0x14   :  { %346 = vmatprep.subr.bf16.mxu1 %v376_v15 }
  0x17   :  { %347 = vmatpush3.bf16.msra.mxu1 %v365_v40 }
  0x18   :  { %348 = vmatprep.subr.bf16.mxu1 %v376_v15 }
  0x1b   :  { %349 = vmatpush3.bf16.msra.mxu1 %v366_v41 }
  0x1c   :  { %350 = vmatprep.subr.bf16.mxu1 %v376_v15 }
  0x1f   :  { %351 = vmatpush3.bf16.msra.mxu1 %v367_v42 }
  0x8e   :  { %v36_v5 = vpop.xlane.xlu0 %35 }
  0x8f   :  { %v41_v6 = vmul.f32 0.03125, %v36_v5 }
  0x91   :  { %v43_v7 = vsub.f32 %v421_v1, %v41_v6 }
  0x92   :  { %v39_v8 = vpop.xlane.xlu0 %38 }
  0x93   :  { %v42_v9 = vmul.f32 0.03125, %v39_v8  ;;  %v45_v10 = vmul.f32 %v43_v7, %v43_v7 }
  0x95   :  { %v44_v11 = vsub.f32 %v423_v2, %v42_v9  ;;  %v47_v12 = vsel %vm33_vm0, %v45_v10, 0.0 }
  0x96   :  { %48 = vadd.xlane.f32.xlu1 %v47_v12 }
  0x97   :  { %v46_v13 = vmul.f32 %v44_v11, %v44_v11 }
  0x99   :  { %v50_v14 = vsel %vm33_vm0, %v46_v13, 0.0 }
  0x9a   :  { %51 = vadd.xlane.f32.xlu1 %v50_v14 }
 0x11f   :  { %v49_v18 = vpop.xlane.xlu1 %48 }
 0x120   :  { %v53_v19 = vmul.f32 0.03125, %v49_v18 }
 0x122   :  { %v55_v20 = vadd.f32 1e-06, %v53_v19 }
 0x123   :  { %v52_v21 = vpop.xlane.xlu1 %51 }
 0x124   :  { %368 = vrsqrt.f32 %v55_v20  ;;  %v54_v22 = vmul.f32 0.03125, %v52_v21 }
 0x126   :  { %v56_v23 = vadd.f32 1e-06, %v54_v22 }
 0x128   :  { %370 = vrsqrt.f32 %v56_v23 }
 0x131   :  { %v369_v24 = vpop.eup %368 }
 0x132   :  { %v59_v25 = vmul.f32 %v369_v24, %v43_v7  ;;  %v299_v7 = vld [vmem:[%s490_s6] ss:$0 sm:$0xff] }
 0x134   :  { %v67_v29 = vmul.f32 %v293_v26, %v59_v25 }
 0x135   :  { %v371_v27 = vpop.eup %370 }
 0x136   :  { %v60_v28 = vmul.f32 %v371_v27, %v44_v11  ;;  %v75_v32 = vadd.f32 %v294_v30, %v67_v29 }
 0x138   :  { %v68_v31 = vmul.f32 %v293_v26, %v60_v28 }
 0x13a   :  { %v76_v33 = vadd.f32 %v294_v30, %v68_v31 }
 0x13c   :  { %v77_v34 = vpack.c.bf16 %v76_v33, %v75_v32 }
 0x13e   :  { %333 = vmatmul.mubr.msk.bf16.vlgmr.msra.gmra.mxu0 %vm33_vm0, %v77_v34 }
 0x1fe   :  { %v138_v44 = vpop.f32.mrf.mxu0 }
 0x1ff   :  { %v139_v45 = vadd.f32 %v295_v43, %v138_v44 }
 0x200   :  { %v334_v46 = vpop.f32.mrf.mxu0 }
 0x201   :  { %v145_v47 = vmul.f32 %v139_v45, %v139_v45 }
 0x202   :  { %v141_v48 = vpop.f32.mrf.mxu0 }
 0x203   :  { %v147_v49 = vmul.f32 %v145_v47, %v139_v45  ;;  %v142_v50 = vadd.f32 %v295_v43, %v141_v48 }
 0x204   :  { %v335_v51 = vpop.f32.mrf.mxu0 }
 0x205   :  { %v149_v52 = vmul.f32 0.044715, %v147_v49  ;;  %v146_v53 = vmul.f32 %v142_v50, %v142_v50 }
 0x207   :  { %v151_v54 = vadd.f32 %v149_v52, %v139_v45  ;;  %v148_v55 = vmul.f32 %v146_v53, %v142_v50 }
 0x209   :  { %v153_v56 = vmul.f32 0.7978846, %v151_v54  ;;  %v150_v57 = vmul.f32 0.044715, %v148_v55 }
 0x20b   :  { %372 = vtanh.f32 %v153_v56  ;;  %v152_v58 = vadd.f32 %v150_v57, %v142_v50 }
 0x20d   :  { %v154_v59 = vmul.f32 0.7978846, %v152_v58 }
 0x20f   :  { %374 = vtanh.f32 %v154_v59 }
 0x218   :  { %v373_v60 = vpop.eup %372 }
 0x219   :  { %v157_v61 = vadd.f32 1.0, %v373_v60 }
 0x21b   :  { %v159_v0 = vmul.f32 0.5, %v157_v61 }
 0x21c   :  { %v375_v62 = vpop.eup %374 }
 0x21d   :  { %v158_v63 = vadd.f32 1.0, %v375_v62  ;;  %v161_v4 = vmul.f32 %v159_v0, %v139_v45 }
 0x21f   :  { %v160_v3 = vmul.f32 0.5, %v158_v63 }
 0x221   :  { %v162_v5 = vmul.f32 %v160_v3, %v142_v50 }
 0x223   :  { %v163_v6 = vpack.c.bf16 %v162_v5, %v161_v4 }
 0x225   :  { %353 = vmatmul.mubr.bf16.vlgmr.msra.gmra.mxu1 %v163_v6 }
 0x2e5   :  { %v269_v8 = vpop.f32.mrf.mxu1 }
 0x2e6   :  { %v270_v9 = vadd.f32 %v299_v7, %v269_v8 }
 0x2e7   :  { %v354_v10 = vpop.f32.mrf.mxu1 }
 0x2e8   :  { %v276_v11 = vadd.f32 %v421_v1, %v270_v9 }
 0x2e9   :  { %v272_v12 = vpop.f32.mrf.mxu1 }
 0x2ea   :  { %v310_v13 = vpack.c.bf16 %v276_v11, %v276_v11  ;;  %v273_v14 = vadd.f32 %v299_v7, %v272_v12 }
 0x2eb   :  { %v355_v15 = vpop.f32.mrf.mxu1 }
 0x2ec   :  { %287 = vst.msk [vmem:[%s491_s7] sm:$0xf] %vm286_vm2, %v310_v13  ;;  %v277_v16 = vadd.f32 %v423_v2, %v273_v14 }
 0x2ee   :  { %v311_v17 = vpack.c.bf16 %v277_v16, %v277_v16 }
 0x2f0   :  { %288 = vst.msk [vmem:[%s491_s7 + $0x4] sm:$0xf] %vm286_vm2, %v311_v17 }

// kernel: vit_forward.10
= control target key start
LH: loop header
LB: loop body
LE: loop exit
PB: predicated region body
PF: predicated region fallthrough
CT: control target
= control target key end

     0   :  { %s1223_s21 = smov 0   ;;  %s1225_s22 = smov 0   ;;  %s1343_s0 = inlined_call_operand.vmem [shape: bf16[2,8,32], index: 0, kind: input, shape index: {}]   ;;  %s1344_s1 = inlined_call_operand.vmem [shape: bf16[2,32,8], index: 1, kind: input, shape index: {}]   ;;  %s1345_s2 = inlined_call_operand.vmem [shape: bf16[2,8,32], index: 2, kind: input, shape index: {}]   ;;  %s1346_s3 = inlined_call_operand.vmem [shape: bf16[32,32], index: 3, kind: input, shape index: {}]   ;;  %s1347_s4 = inlined_call_operand.vmem [shape: f32[1,32], index: 4, kind: input, shape index: {}]   ;;  %s1348_s5 = inlined_call_operand.vmem [shape: bf16[2,8,32], index: 5, kind: input, shape index: {}]   ;;  %s1349_s6 = inlined_call_operand.vmem [shape: bf16[2,8,32], index: 6, kind: output, shape index: {}]  }
   0x1   :  { %s1227_s23 = smov 0  }
   0x2 LB: > { %s28_s24 = sadd.s32 1, %s1174_s22  ;;  %p1005_p0 = scmp.ge.s32.totalorder %s1178_s23, 1  ;;  %s1178_s23 = sphi %s1227_s23, %s16_s23   ;;  %s1174_s22 = sphi %s1225_s22, %s1351_s22   ;;  %s1170_s21 = sphi %s1223_s21, %s1350_s21  }
   0x3   : > { %p30_p1 = scmp.ge.s32.totalorder %s28_s24, 2  ;;  %p263_p2 = scmp.lt.s32.totalorder %s1178_s23, 3 }
   0x5   : > { %s1353_s24 = smov (%p30_p1, %s28_s24), 0  ;;  %p264_p3 = pnand %p1005_p0, %p263_p2 }
   0x6   : > { %p313_p4 = scmp.lt.s32.totalorder (!%p264_p3), %s1170_s21, 1  ;;  %s1182_s9 = smov (!%p264_p3), 120  }
   0x7   : > { %267 = sbr.rel (%p264_p3) target bundleno = 1208 (0x4b8), region = 44  ;;  %s1183_s10 = smov (!%p264_p3), 104  }
   0x8   : > { %s1184_s11 = smov (!%p264_p3), 112   ;;  %s1185_s19 = smov (!%p264_p3), 8  }
   0x9   : > { %s1186_s20 = smov (!%p264_p3), 16  }
   0xc   : > { %v1180_v0 = vmov 0.0   ;;  %vm1181_vm0 = vmmov 0   ;;  %s1355_s21 = smov (!%p313_p4, %s1170_s21), 1  ;;  %vm354_vm1 = vcmask 1043456   ;;  %vm350_vm2 = vcmask 64512  }
   0xd   : > { %1048 = vmatprep.subr.bf16.mxu0 %v1180_v0  ;;  %1050 = vmatprep.mubr.msk.bf16.mxu0 %vm1181_vm0, %v1180_v0  ;;  %s1028_s25 = sshll.u32 %s1355_s21, 4  ;;  %s1247_s26 = sshll.u32 %s1355_s21, 2  ;;  %v399_v14 = vlaneseq  ;;  %vm810_vm4 = vcmask 130048   ;;  %vm812_vm5 = vcmask 195584   ;;  %vm838_vm6 = vcmask 261120  }
   0xe   : > { %1054 = vmatprep.subr.bf16.mxu1 %v1180_v0  ;;  %1056 = vmatprep.mubr.msk.bf16.mxu1 %vm1181_vm0, %v1180_v0  ;;  %s324_s29 = scalar_lea.vmem %s1344_s1, %s1028_s25  ;;  %s319_s8 = scalar_lea.vmem %s1343_s0, %s1247_s26  ;;  %vm886_vm7 = vcmask 257024  }
   0xf   : > { %v345_v1 = vld [vmem:[%s324_s29] sm:$0xf]  ;;  %v346_v3 = vld [vmem:[%s324_s29 + $0x4] sm:$0xf]  ;;  %v347_v7 = vld [vmem:[%s324_s29 + $0x8] sm:$0xf]  ;;  %s328_s14 = scalar_lea.vmem %s1345_s2, %s1247_s26  ;;  %s335_s28 = scalar_lea.vmem %s1348_s5, %s1247_s26 }
  0x10   : > { %v344_v2 = vld [vmem:[%s319_s8] sm:$0xf]  ;;  %v356_v4 = vsel %vm354_vm1, %v345_v1, 0  ;;  %v470_v6 = vsel %vm354_vm1, %v346_v3, 0  ;;  %v583_v8 = vsel %vm354_vm1, %v347_v7, 0  ;;  %v400_v15 = vand.u32 127, %v399_v14 }
  0x11   : > { %v1014_v5 = vcombine.low %v344_v2, %v344_v2  ;;  %1049 = vmatpush3.bf16.msra.mxu0 %v356_v4  ;;  %v348_v10 = vld [vmem:[%s324_s29 + $0xc] sm:$0xf]  ;;  %v349_v49 = vld [vmem:[%s328_s14] sm:$0xf]  ;;  %s1187_s21 = smov 24  }
  0x12   : > { %1060 = vmatprep.subr.bf16.mxu0 %v1180_v0  ;;  %v693_v12 = vsel %vm354_vm1, %v348_v10, 0  ;;  %vm401_vm3 = vcmp.lt.s32.totalorder %v400_v15, 5  ;;  %v419_v50 = vsel %vm354_vm1, %v349_v49, 0  ;;  %v1016_v61 = vcombine.low %v349_v49, %v349_v49 }
  0x13   : > { %464 = vrot.lane.b32.xlu0 %v1014_v5, %s1182_s9  ;;  %687 = vrot.lane.b32.xlu1 %v1014_v5, %s1183_s10 }
  0x14   : > { %1051 = vmatmul.mubr.msk.bf16.vlgmr.msra.gmra.mxu0 %vm350_vm2, %v344_v2  ;;  %1055 = vmatpush3.bf16.msra.mxu1 %v419_v50  ;;  %v882_v50 = vld [vmem:[%s335_s28] sm:$0xf] }
  0x15   : > { %1061 = vmatpush3.bf16.msra.mxu0 %v470_v6  ;;  %1062 = vmatprep.mubr.msk.bf16.mxu0 %vm1181_vm0, %v1180_v0 }
  0x16   : > { %1072 = vmatprep.subr.bf16.mxu0 %v1180_v0  ;;  %1066 = vmatprep.subr.bf16.mxu1 %v1180_v0 }
  0x17   : > { %577 = vrot.lane.b32.xlu0 %v1014_v5, %s1184_s11 }
  0x85   : > { %v465_v9 = vpop.permute.xlu0 %464  ;;  %v688_v13 = vpop.permute.xlu1 %687 }
  0x86   : > { %1063 = vmatmul.mubr.msk.bf16.vlgmr.msra.gmra.mxu0 %vm350_vm2, %v465_v9 }
  0x87   : > { %1073 = vmatpush3.bf16.msra.mxu0 %v583_v8  ;;  %1074 = vmatprep.mubr.msk.bf16.mxu0 %vm1181_vm0, %v1180_v0 }
  0x88   : > { %1084 = vmatprep.subr.bf16.mxu0 %v1180_v0 }
  0x89   : > { %v578_v11 = vpop.permute.xlu0 %577 }
  0x8e   : > { %1075 = vmatmul.mubr.msk.bf16.vlgmr.msra.gmra.mxu0 %vm350_vm2, %v578_v11 }
  0x8f   : > { %1085 = vmatpush3.bf16.msra.mxu0 %v693_v12  ;;  %1086 = vmatprep.mubr.msk.bf16.mxu0 %vm1181_vm0, %v1180_v0 }
  0x90   : > { %1096 = vmatprep.subr.bf16.mxu0 %v1180_v0 }
  0x96   : > { %1087 = vmatmul.mubr.msk.bf16.vlgmr.msra.gmra.mxu0 %vm350_vm2, %v688_v13 }
  0x97   : > { %1100 = vmatprep.mubr.msk.bf16.mxu0 %vm1181_vm0, %v1180_v0 }
  0xd4   : > { %v392_v16 = vpop.f32.mrf.mxu0 }
  0xd5   : > { %v398_v17 = vmul.f32 0.35355338, %v392_v16 }
  0xd6   : > { %v1052_v18 = vpop.f32.mrf.mxu0 }
  0xd7   : > { %v402_v19 = vsel %vm401_vm3, %v398_v17, -1e+30 }
  0xd8   : > { %v403_v20 = vsel %vm350_vm2, %v402_v19, -inf  ;;  %v395_v21 = vpop.f32.mrf.mxu0 }
  0xd9   : > { %404 = vmax.xlane.f32.xlu1 %v403_v20 }
  0xda   : > { %v1053_v22 = vpop.f32.mrf.mxu0 }
 0x146   : > { %v506_v23 = vpop.f32.mrf.mxu0 }
 0x147   : > { %v512_v24 = vmul.f32 0.35355338, %v506_v23 }
 0x148   : > { %v1064_v25 = vpop.f32.mrf.mxu0 }
 0x149   : > { %v513_v26 = vsel %vm401_vm3, %v512_v24, -1e+30 }
 0x14a   : > { %v509_v27 = vpop.f32.mrf.mxu0  ;;  %v514_v28 = vsel %vm350_vm2, %v513_v26, -inf }
 0x14b   : > { %515 = vmax.xlane.f32.xlu0 %v514_v28 }
 0x14c   : > { %v1065_v29 = vpop.f32.mrf.mxu0 }
 0x14e   : > { %v619_v30 = vpop.f32.mrf.mxu0 }
 0x14f   : > { %v625_v31 = vmul.f32 0.35355338, %v619_v30  ;;  %v1138_v30 = vld [vmem:[%s1346_s3 + $0x8] sm:$0xff]  }
 0x150   : > { %v1076_v32 = vpop.f32.mrf.mxu0  ;;  %1097 = vmatpush3.bf16.msra.mxu0 %v1138_v30 }
 0x151   : > { %v626_v33 = vsel %vm401_vm3, %v625_v31, -1e+30  ;;  %v1139_v31 = vld [vmem:[%s1346_s3] sm:$0xff]   ;;  %1098 = vmatprep.subr.bf16.mxu0 %v1180_v0 }
 0x152   : > { %v622_v34 = vpop.f32.mrf.mxu0  ;;  %v627_v35 = vsel %vm350_vm2, %v626_v33, -inf }
 0x153   : > { %628 = vmax.xlane.f32.xlu0 %v627_v35 }
 0x154   : > { %v1077_v36 = vpop.f32.mrf.mxu0  ;;  %1099 = vmatpush3.bf16.msra.mxu0 %v1139_v31 }
 0x156   : > { %v729_v37 = vpop.f32.mrf.mxu0 }
 0x157   : > { %v735_v38 = vmul.f32 0.35355338, %v729_v37 }
 0x158   : > { %v1088_v39 = vpop.f32.mrf.mxu0 }
 0x159   : > { %v736_v40 = vsel %vm401_vm3, %v735_v38, -1e+30 }
 0x15a   : > { %v737_v41 = vsel %vm350_vm2, %v736_v40, -inf  ;;  %v732_v42 = vpop.f32.mrf.mxu0 }
 0x15b   : > { %738 = vmax.xlane.f32.xlu1 %v737_v41 }
 0x15c   : > { %v1089_v43 = vpop.f32.mrf.mxu0 }
 0x162   : > { %v405_v44 = vpop.xlane.xlu1 %404 }
 0x163   : > { %v406_v45 = vsub.f32 %v402_v19, %v405_v44 }
 0x165   : > { %v407_v46 = vmul.f32 1.442695, %v406_v45 }
 0x167   : > { %1140 = vpow2.f32 %v407_v46 }
 0x174   : > { %v1141_v47 = vpop.eup %1140 }
 0x175   : > { %v409_v48 = vsel %vm350_vm2, %v1141_v47, 0.0 }
 0x176   : > { %410 = vadd.xlane.f32.xlu0 %v409_v48 }
 0x1d4   : > { %v516_v51 = vpop.xlane.xlu0 %515 }
 0x1d5   : > { %v517_v52 = vsub.f32 %v513_v26, %v516_v51  ;;  %v1022_v51 = vld [vmem:[%s1347_s4] ss:$0 sm:$0xff] }
 0x1d7   : > { %v518_v53 = vmul.f32 1.442695, %v517_v52  ;;  %v883_v52 = vunpack.c.l.bf16 %v882_v50 }
 0x1d9   : > { %1142 = vpow2.f32 %v518_v53 }
 0x1dc   : > { %v629_v54 = vpop.xlane.xlu0 %628 }
 0x1dd   : > { %v630_v55 = vsub.f32 %v626_v33, %v629_v54 }
 0x1df   : > { %v631_v56 = vmul.f32 1.442695, %v630_v55 }
 0x1e1   : > { %1144 = vpow2.f32 %v631_v56 }
 0x1e4   : > { %v739_v63 = vpop.xlane.xlu1 %738 }
 0x1e5   : > { %v740_v1 = vsub.f32 %v736_v40, %v739_v63 }
 0x1e6   : > { %v1143_v57 = vpop.eup %1142 }
 0x1e7   : > { %v520_v58 = vsel %vm350_vm2, %v1143_v57, 0.0  ;;  %v741_v2 = vmul.f32 1.442695, %v740_v1 }
 0x1e8   : > { %521 = vadd.xlane.f32.xlu1 %v520_v58 }
 0x1ee   : > { %v1145_v59 = vpop.eup %1144 }
 0x1ef   : > { %v633_v60 = vsel %vm350_vm2, %v1145_v59, 0.0 }
 0x1f0   : > { %634 = vadd.xlane.f32.xlu0 %v633_v60 }
 0x1f9   : > { %639 = vrot.lane.b32.xlu1 %v1016_v61, %s1184_s11 }
 0x1ff   : > { %v411_v62 = vpop.xlane.xlu0 %410 }
 0x200   : > { %1146 = vrcp.f32 %v411_v62 }
 0x201   : > { %1148 = vpow2.f32 %v741_v2 }
 0x206   : > { %529 = vrot.lane.b32.xlu0 %v1016_v61, %s1182_s9  ;;  %s342_s9 = scalar_lea.vmem %s1349_s6, %s1247_s26 }
 0x20d   : > { %v1147_v3 = vpop.eup %1146 }
 0x20e   : > { %v413_v4 = vmul.f32 %v1147_v3, %v1141_v47  ;;  %v1149_v6 = vpop.eup %1148 }
 0x20f   : > { %v743_v7 = vsel %vm350_vm2, %v1149_v6, 0.0 }
 0x210   : > { %v414_v5 = vpack.c.bf16 %v413_v4, %v413_v4 }
 0x212   : > { %1057 = vmatmul.mubr.msk.bf16.vlgmr.msra.gmra.mxu1 %vm350_vm2, %v414_v5 }
 0x213   : > { %1068 = vmatprep.mubr.msk.bf16.mxu1 %vm1181_vm0, %v1180_v0 }
 0x21d   : > { %744 = vadd.xlane.f32.xlu1 %v743_v7 }
 0x22e   : > { %749 = vrot.lane.b32.xlu1 %v1016_v61, %s1183_s10 }
 0x271   : > { %v522_v8 = vpop.xlane.xlu1 %521 }
 0x272   : > { %1150 = vrcp.f32 %v522_v8 }
 0x275   : > { %v640_v14 = vpop.permute.xlu1 %639 }
 0x276   : > { %v645_v16 = vsel %vm354_vm1, %v640_v14, 0 }
 0x279   : > { %v635_v9 = vpop.xlane.xlu0 %634 }
 0x27a   : > { %1152 = vrcp.f32 %v635_v9 }
 0x27d   : > { %v530_v10 = vpop.permute.xlu0 %529 }
 0x27e   : > { %v535_v11 = vsel %vm354_vm1, %v530_v10, 0 }
 0x27f   : > { %v1151_v12 = vpop.eup %1150  ;;  %1067 = vmatpush3.bf16.msra.mxu1 %v535_v11 }
 0x280   : > { %1078 = vmatprep.subr.bf16.mxu1 %v1180_v0  ;;  %v524_v13 = vmul.f32 %v1151_v12, %v1143_v57 }
 0x282   : > { %v525_v15 = vpack.c.bf16 %v524_v13, %v524_v13 }
 0x284   : > { %1069 = vmatmul.mubr.msk.bf16.vlgmr.msra.gmra.mxu1 %vm350_vm2, %v525_v15 }
 0x285   : > { %1079 = vmatpush3.bf16.msra.mxu1 %v645_v16  ;;  %1080 = vmatprep.mubr.msk.bf16.mxu1 %vm1181_vm0, %v1180_v0 }
 0x286   : > { %1090 = vmatprep.subr.bf16.mxu1 %v1180_v0 }
 0x287   : > { %v1153_v17 = vpop.eup %1152 }
 0x288   : > { %v637_v18 = vmul.f32 %v1153_v17, %v1145_v59 }
 0x28a   : > { %v638_v19 = vpack.c.bf16 %v637_v18, %v637_v18 }
 0x28c   : > { %1081 = vmatmul.mubr.msk.bf16.vlgmr.msra.gmra.mxu1 %vm350_vm2, %v638_v19 }
 0x28d   : > { %1092 = vmatprep.mubr.msk.bf16.mxu1 %vm1181_vm0, %v1180_v0 }
 0x2a6   : > { %v745_v20 = vpop.xlane.xlu1 %744 }
 0x2a7   : > { %1154 = vrcp.f32 %v745_v20 }
 0x2aa   : > { %v750_v21 = vpop.permute.xlu1 %749 }
 0x2ab   : > { %v755_v22 = vsel %vm354_vm1, %v750_v21, 0 }
 0x2ac   : > { %1091 = vmatpush3.bf16.msra.mxu1 %v755_v22 }
 0x2b4   : > { %v1155_v23 = vpop.eup %1154 }
 0x2b5   : > { %v747_v24 = vmul.f32 %v1155_v23, %v1149_v6 }
 0x2b7   : > { %v748_v25 = vpack.c.bf16 %v747_v24, %v747_v24 }
 0x2b9   : > { %1093 = vmatmul.mubr.msk.bf16.vlgmr.msra.gmra.mxu1 %vm350_vm2, %v748_v25 }
 0x2d2   : > { %v455_v26 = vpop.f32.mrf.mxu1 }
 0x2d4   : > { %v1058_v27 = vpop.f32.mrf.mxu1 }
 0x2d6   : > { %v458_v28 = vpop.f32.mrf.mxu1 }
 0x2d8   : > { %v1059_v29 = vpop.f32.mrf.mxu1 }
 0x344   : > { %v571_v32 = vpop.f32.mrf.mxu1 }
 0x345   : > { %798 = vrot.lane.b32.xlu0 %v571_v32, %s1185_s19 }
 0x346   : > { %v1070_v33 = vpop.f32.mrf.mxu1 }
 0x348   : > { %v574_v34 = vpop.f32.mrf.mxu1 }
 0x34a   : > { %v1071_v35 = vpop.f32.mrf.mxu1 }
 0x34c   : > { %v681_v36 = vpop.f32.mrf.mxu1 }
 0x34d   : > { %802 = vrot.lane.b32.xlu1 %v681_v36, %s1186_s20 }
 0x34e   : > { %v1082_v37 = vpop.f32.mrf.mxu1 }
 0x350   : > { %v684_v38 = vpop.f32.mrf.mxu1 }
 0x352   : > { %v1083_v39 = vpop.f32.mrf.mxu1 }
 0x379   : > { %v791_v40 = vpop.f32.mrf.mxu1 }
 0x37a   : > { %806 = vrot.lane.b32.xlu0 %v791_v40, %s1187_s21 }
 0x37b   : > { %v1094_v41 = vpop.f32.mrf.mxu1 }
 0x37d   : > { %v794_v42 = vpop.f32.mrf.mxu1 }
 0x37f   : > { %v1095_v0 = vpop.f32.mrf.mxu1 }
 0x3b7   : > { %v799_v43 = vpop.permute.xlu0 %798 }
 0x3b8   : > { %v809_v45 = vsel %vm350_vm2, %v455_v26, %v799_v43 }
 0x3bf   : > { %v803_v44 = vpop.permute.xlu1 %802 }
 0x3c0   : > { %v811_v46 = vsel %vm810_vm4, %v809_v45, %v803_v44 }
 0x3ec   : > { %v807_v47 = vpop.permute.xlu0 %806 }
 0x3ed   : > { %v813_v48 = vsel %vm812_vm5, %v811_v46, %v807_v47 }
 0x3ee   : > { %v814_v49 = vpack.c.bf16 %v813_v48, %v813_v48 }
 0x3f0   : > { %1101 = vmatmul.mubr.msk.bf16.vlgmr.msra.gmra.mxu0 %vm838_vm6, %v814_v49 }
 0x4b0   : > { %v876_v53 = vpop.f32.mrf.mxu0 }
 0x4b1   : > { %v877_v54 = vadd.f32 %v1022_v51, %v876_v53 }
 0x4b2   : > { %v1102_v55 = vpop.f32.mrf.mxu0 }
 0x4b3   : > { %v884_v56 = vadd.f32 %v883_v52, %v877_v54 }
 0x4b4   : > { %v879_v57 = vpop.f32.mrf.mxu0 }
 0x4b5   : > { %v885_v58 = vpack.c.bf16 %v884_v56, %v884_v56 }
 0x4b6   : > { %v1103_v59 = vpop.f32.mrf.mxu0 }
 0x4b7   : > { %887 = vst.msk [vmem:[%s342_s9] sm:$0xf] %vm886_vm7, %v885_v58 }
 0x4b8 PF: > { %s16_s23 = sadd.s32 1, %s1178_s23   ;;  %s1350_s21 = smov %s1174_s22 }
 0x4b9   : > { %p13_p5 = scmp.ge.s32.totalorder %s16_s23, 4   ;;  %s1351_s22 = smov %s1353_s24 }
 0x4bb   :  { %15 = sbr.rel (!%p13_p5) target bundleno = 2 (0x2), region = 83 }

// kernel: vit_forward.15
= control target key start
LH: loop header
LB: loop body
LE: loop exit
PB: predicated region body
PF: predicated region fallthrough
CT: control target
= control target key end

     0   :  { %vm25_vm0 = vcmask 261120   ;;  %v149_v8 = vmov 0.0   ;;  %vm150_vm1 = vmmov 0   ;;  %s205_s0 = inlined_call_operand.vmem [shape: bf16[8,32], index: 0, kind: input, shape index: {}]   ;;  %s206_s3 = inlined_call_operand.vmem [shape: bf16[32,128], index: 3, kind: input, shape index: {}]   ;;  %s207_s1 = inlined_call_operand.vmem [shape: f32[1,32], index: 1, kind: input, shape index: {}]   ;;  %s208_s2 = inlined_call_operand.vmem [shape: f32[1,32], index: 2, kind: input, shape index: {}]   ;;  %s209_s4 = inlined_call_operand.vmem [shape: f32[1,128], index: 4, kind: input, shape index: {}]   ;;  %s210_s5 = inlined_call_operand.vmem [shape: f32[8,128], index: 5, kind: output, shape index: {}]  }
   0x1   :  { %v21_v0 = vld [vmem:[%s205_s0] sm:$0xf]  ;;  %135 = vmatprep.subr.bf16.mxu0 %v149_v8  ;;  %v145_v9 = vld [vmem:[%s206_s3 + $0x8] sm:$0xff]   ;;  %139 = vmatprep.mubr.msk.bf16.mxu0 %vm150_vm1, %v149_v8 }
   0x2   :  { %v24_v1 = vunpack.c.l.bf16 %v21_v0  ;;  %136 = vmatpush3.bf16.msra.mxu0 %v145_v9  ;;  %v146_v10 = vld [vmem:[%s206_s3] sm:$0xff]  }
   0x3   :  { %137 = vmatprep.subr.bf16.mxu0 %v149_v8  ;;  %v126_v15 = vld [vmem:[%s207_s1] ss:$0 sm:$0xff] }
   0x4   :  { %v26_v2 = vsel %vm25_vm0, %v24_v1, 0.0  ;;  %v127_v17 = vld [vmem:[%s208_s2] ss:$0 sm:$0xff] }
   0x5   :  { %27 = vadd.xlane.f32.xlu0 %v26_v2  ;;  %v128_v21 = vld [vmem:[%s209_s4] ss:$0 sm:$0xff] }
   0x6   :  { %138 = vmatpush3.bf16.msra.mxu0 %v146_v10 }
  0x8e   :  { %v28_v3 = vpop.xlane.xlu0 %27 }
  0x8f   :  { %v30_v4 = vmul.f32 0.03125, %v28_v3 }
  0x91   :  { %v31_v5 = vsub.f32 %v24_v1, %v30_v4 }
  0x93   :  { %v32_v6 = vmul.f32 %v31_v5, %v31_v5 }
  0x95   :  { %v33_v7 = vsel %vm25_vm0, %v32_v6, 0.0 }
  0x96   :  { %34 = vadd.xlane.f32.xlu0 %v33_v7 }
 0x11f   :  { %v35_v11 = vpop.xlane.xlu0 %34 }
 0x120   :  { %v36_v12 = vmul.f32 0.03125, %v35_v11 }
 0x122   :  { %v37_v13 = vadd.f32 1e-06, %v36_v12 }
 0x124   :  { %147 = vrsqrt.f32 %v37_v13 }
 0x131   :  { %v148_v14 = vpop.eup %147 }
 0x132   :  { %v39_v16 = vmul.f32 %v148_v14, %v31_v5 }
 0x134   :  { %v46_v18 = vmul.f32 %v126_v15, %v39_v16 }
 0x136   :  { %v53_v19 = vadd.f32 %v127_v17, %v46_v18 }
 0x138   :  { %v54_v20 = vpack.c.bf16 %v53_v19, %v53_v19 }
 0x13a   :  { %140 = vmatmul.mubr.msk.bf16.vlgmr.msra.gmra.mxu0 %vm25_vm0, %v54_v20 }
 0x1fa   :  { %v115_v22 = vpop.f32.mrf.mxu0 }
 0x1fb   :  { %v116_v23 = vadd.f32 %v128_v21, %v115_v22 }
 0x1fc   :  { %v141_v24 = vpop.f32.mrf.mxu0 }
 0x1fd   :  { %121 = vst [vmem:[%s210_s5] sm:$0xff] %v116_v23 }
 0x1fe   :  { %v118_v25 = vpop.f32.mrf.mxu0 }
 0x200   :  { %v142_v26 = vpop.f32.mrf.mxu0 }

</bundles_post_ra>
